<compile_context>
chip_gen: v7x
topology: tpu7x:2x2x1
jax: 0.10.0
libtpu: 0.0.40
codegen_flags: <defaults>
</compile_context>

<pallas_src>
import jax
import jax.numpy as jnp
import numpy as np
from jax import lax
from jax.experimental import pallas as pl
from jax.experimental.pallas import tpu as pltpu


def _encoder_kernel(seq_ref, len_ref,
                    wx1_ref, bx1_ref, wx2_ref, bx2_ref,
                    wh1_ref, bh1_ref, wh2_ref, bh2_ref,
                    out_ref):
    Bt, S, E = seq_ref.shape
    H = wh1_ref.shape[0]

    # Load every weight/bias once (loop-invariant).
    seq = seq_ref[...]                            # (Bt, S, E) bf16
    wx1 = wx1_ref[...]; bx1 = bx1_ref[...]        # (E, H/2) bf16, (1, H/2) f32
    wx2 = wx2_ref[...]; bx2 = bx2_ref[...]        # (H/2, H) bf16, (1, H)  f32
    wh1 = wh1_ref[...]; bh1 = bh1_ref[...]        # (H, H/2) bf16, (1, H/2) f32
    wh2 = wh2_ref[...]; bh2 = bh2_ref[...]        # (H/2, H) bf16, (1, H)  f32

    # ---- Hoisted, time-invariant xh path ---------------------------------
    # xh(seq[:, t]) does not depend on the hidden state: two large batched
    # matmuls instead of 2*S tiny ones inside the recurrence.
    x_flat = seq.reshape(Bt * S, E)               # tile-aligned collapse (S % 8 == 0)
    xh1 = jnp.maximum(
        jnp.dot(x_flat, wx1, preferred_element_type=jnp.float32) + bx1, 0.0)
    xh_all = (jnp.dot(xh1.astype(jnp.bfloat16), wx2,
                      preferred_element_type=jnp.float32) + bx2)
    xh_all = xh_all.reshape(Bt, S, H)             # (Bt, S, H) f32

    # mask[b, t] = t < input_lengths[b]
    t_idx = lax.broadcasted_iota(jnp.int32, (Bt, S), 1)
    mask = t_idx < len_ref[...]                   # (Bt, S) bool

    # Hoisted bias broadcasts (JAX does not CSE broadcast_in_dim per step).
    bh1_b = jnp.broadcast_to(bh1, (Bt, H // 2))
    bh2_b = jnp.broadcast_to(bh2, (Bt, H))

    # ---- Serial recurrence: fully unrolled (S static & small) -------------
    # For large S / B*H, switch to per-step stores into a VMEM scratch slab
    # (or directly into out_ref lane slices) to bound vreg live ranges.
    h = jnp.zeros((Bt, H), jnp.float32)
    records = []
    for t in range(S):
        hh1 = jnp.maximum(
            jnp.dot(h.astype(jnp.bfloat16), wh1,
                    preferred_element_type=jnp.float32) + bh1_b, 0.0)
        hh = (jnp.dot(hh1.astype(jnp.bfloat16), wh2,
                      preferred_element_type=jnp.float32) + bh2_b)
        temp = jnp.tanh(xh_all[:, t, :] + hh)
        h = jnp.where(mask[:, t:t + 1], temp, h)
        records.append(h)

    # One lane-dense slab store: record t at lanes [t*H, (t+1)*H).
    out_ref[...] = jnp.concatenate(records, axis=-1)   # (Bt, S*H), unmasked vst


def luong_encoder_forward(params, seq, input_lengths):
    B, S, E = seq.shape
    H = params["wx2"].shape[1]
    Hh = H // 2

    # Batch tile: sublane-aligned (8 for f32) when possible.
    Bt = 8 if B % 8 == 0 else B
    grid = (B // Bt,)

    lengths = input_lengths.astype(jnp.int32).reshape(B, 1)

    # bf16 MXU operands; biases stay f32 (added post-accumulation).
    bf16 = jnp.bfloat16
    seq_bf = seq.astype(bf16)
    wx1 = params["wx1"].astype(bf16); bx1 = params["bx1"]
    wx2 = params["wx2"].astype(bf16); bx2 = params["bx2"]
    wh1 = params["wh1"].astype(bf16); bh1 = params["bh1"]
    wh2 = params["wh2"].astype(bf16); bh2 = params["bh2"]

    in_specs = [
        pl.BlockSpec((Bt, S, E), lambda i: (i, 0, 0)),    # seq: batch-tiled
        pl.BlockSpec((Bt, 1), lambda i: (i, 0)),          # lengths: batch-tiled
        pl.BlockSpec((E, Hh), lambda i: (0, 0)),          # wx1
        pl.BlockSpec((1, Hh), lambda i: (0, 0)),          # bx1
        pl.BlockSpec((Hh, H), lambda i: (0, 0)),          # wx2
        pl.BlockSpec((1, H), lambda i: (0, 0)),           # bx2
        pl.BlockSpec((H, Hh), lambda i: (0, 0)),          # wh1
        pl.BlockSpec((1, Hh), lambda i: (0, 0)),          # bh1
        pl.BlockSpec((Hh, H), lambda i: (0, 0)),          # wh2
        pl.BlockSpec((1, H), lambda i: (0, 0)),           # bh2
    ]
    out_spec = pl.BlockSpec((Bt, S * H), lambda i: (i, 0))

    out_flat = pl.pallas_call(
        _encoder_kernel,
        grid=grid,
        out_shape=jax.ShapeDtypeStruct((B, S * H), jnp.float32),
        in_specs=in_specs,
        out_specs=out_spec,
        compiler_params=pltpu.CompilerParams(
            dimension_semantics=("parallel",)),
    )(seq_bf, lengths, wx1, bx1, wx2, bx2, wh1, bh1, wh2, bh2)

    # Free row-major view: lane block t of each row == record at timestep t.
    return out_flat.reshape(B, S, H)


def init_params(key, embedding_size, hidden_size):
    E, H = embedding_size, hidden_size

    def lin(k, fan_in, fan_out):
        kw, kb = jax.random.split(k)
        s = 1.0 / np.sqrt(fan_in)
        w = jax.random.uniform(kw, (fan_in, fan_out), jnp.float32, -s, s)
        b = jax.random.uniform(kb, (1, fan_out), jnp.float32, -s, s)
        return w, b

    ks = jax.random.split(key, 4)
    wx1, bx1 = lin(ks[0], E, H // 2)
    wx2, bx2 = lin(ks[1], H // 2, H)
    wh1, bh1 = lin(ks[2], H, H // 2)
    wh2, bh2 = lin(ks[3], H // 2, H)
    return dict(wx1=wx1, bx1=bx1, wx2=wx2, bx2=bx2,
                wh1=wh1, bh1=bh1, wh2=wh2, bh2=bh2)


def reference_forward(params, seq, input_lengths):
    """Pure-JAX reference mirroring the PyTorch forward (same bf16 MXU
    operand precision as the kernel, f32 accumulation)."""
    B, S, E = seq.shape
    H = params["wx2"].shape[1]
    bf16 = jnp.bfloat16

    def dense(x, w, b):
        return jnp.dot(x.astype(bf16), w.astype(bf16),
                       preferred_element_type=jnp.float32) + b

    mask = jnp.arange(S)[None, :] < input_lengths[:, None]      # (B, S)
    h = jnp.zeros((B, H), jnp.float32)
    recs = []
    for t in range(S):
        token = seq[:, t, :]
        xh = dense(jax.nn.relu(dense(token, params["wx1"], params["bx1"])),
                   params["wx2"], params["bx2"])
        hh = dense(jax.nn.relu(dense(h, params["wh1"], params["bh1"])),
                   params["wh2"], params["bh2"])
        temp = jnp.tanh(xh + hh)
        h = jnp.where(mask[:, t:t + 1], temp, h)
        recs.append(h)
    return jnp.stack(recs, axis=1)               # (B, S, H)


if __name__ == "__main__":
    # batch, embedding_size, hidden_size, seq_len (B chosen sublane-aligned
    # so the batch grid = (2,) is actually exercised).
    B, E, H, S = 16, 32, 32, 8

    key = jax.random.PRNGKey(0)
    kp, kx, kl = jax.random.split(key, 3)
    params = init_params(kp, E, H)
    seq = jax.random.normal(kx, (B, S, E), jnp.float32)
    input_lengths = jax.random.randint(kl, (B,), 1, S + 1).astype(jnp.int32)

    out = luong_encoder_forward(params, seq, input_lengths)
    out = jax.block_until_ready(out)

    ref = reference_forward(params, seq, input_lengths)
    assert out.shape == (B, S, H), out.shape
    np.testing.assert_allclose(np.asarray(out), np.asarray(ref),
                               rtol=1e-4, atol=1e-4)
    print("KERNEL_OK")
</pallas_src>

<mosaic_0001>
module attributes {stable_mosaic.version = 11 : i64} {
  func.func @_encoder_kernel(%arg0: i32, %arg1: memref<8x8x32xbf16, #tpu.memory_space<vmem>>, %arg2: memref<8x1xi32, #tpu.memory_space<vmem>>, %arg3: memref<32x16xbf16, #tpu.memory_space<vmem>>, %arg4: memref<1x16xf32, #tpu.memory_space<vmem>>, %arg5: memref<16x32xbf16, #tpu.memory_space<vmem>>, %arg6: memref<1x32xf32, #tpu.memory_space<vmem>>, %arg7: memref<32x16xbf16, #tpu.memory_space<vmem>>, %arg8: memref<1x16xf32, #tpu.memory_space<vmem>>, %arg9: memref<16x32xbf16, #tpu.memory_space<vmem>>, %arg10: memref<1x32xf32, #tpu.memory_space<vmem>>, %arg11: memref<8x256xf32, #tpu.memory_space<vmem>>) attributes {dimension_semantics = [#tpu.dimension_semantics<parallel>], iteration_bounds = array<i64: 2>, scalar_prefetch = 0 : i64, scratch_operands = 0 : i64, tpu.core_type = #tpu.core_type<tc>, window_params = [{transform_indices = @transform_0, window_bounds = array<i64: 8, 8, 32>}, {transform_indices = @transform_1, window_bounds = array<i64: 8, 1>}, {pipeline_mode = #tpu.pipeline_mode<synchronous>, transform_indices = @transform_2, window_bounds = array<i64: 32, 16>}, {pipeline_mode = #tpu.pipeline_mode<synchronous>, transform_indices = @transform_3, window_bounds = array<i64: 1, 16>}, {pipeline_mode = #tpu.pipeline_mode<synchronous>, transform_indices = @transform_4, window_bounds = array<i64: 16, 32>}, {pipeline_mode = #tpu.pipeline_mode<synchronous>, transform_indices = @transform_5, window_bounds = array<i64: 1, 32>}, {pipeline_mode = #tpu.pipeline_mode<synchronous>, transform_indices = @transform_6, window_bounds = array<i64: 32, 16>}, {pipeline_mode = #tpu.pipeline_mode<synchronous>, transform_indices = @transform_7, window_bounds = array<i64: 1, 16>}, {pipeline_mode = #tpu.pipeline_mode<synchronous>, transform_indices = @transform_8, window_bounds = array<i64: 16, 32>}, {pipeline_mode = #tpu.pipeline_mode<synchronous>, transform_indices = @transform_9, window_bounds = array<i64: 1, 32>}, {transform_indices = @transform_10, window_bounds = array<i64: 8, 256>}]} {
    %c0 = arith.constant 0 : index
    %c0_0 = arith.constant 0 : index
    %c0_1 = arith.constant 0 : index
    %0 = vector.load %arg1[%c0, %c0_0, %c0_1] : memref<8x8x32xbf16, #tpu.memory_space<vmem>>, vector<8x8x32xbf16>
    %c0_2 = arith.constant 0 : index
    %c0_3 = arith.constant 0 : index
    %1 = vector.load %arg3[%c0_2, %c0_3] : memref<32x16xbf16, #tpu.memory_space<vmem>>, vector<32x16xbf16>
    %c0_4 = arith.constant 0 : index
    %c0_5 = arith.constant 0 : index
    %2 = vector.load %arg4[%c0_4, %c0_5] : memref<1x16xf32, #tpu.memory_space<vmem>>, vector<1x16xf32>
    %c0_6 = arith.constant 0 : index
    %c0_7 = arith.constant 0 : index
    %3 = vector.load %arg5[%c0_6, %c0_7] : memref<16x32xbf16, #tpu.memory_space<vmem>>, vector<16x32xbf16>
    %c0_8 = arith.constant 0 : index
    %c0_9 = arith.constant 0 : index
    %4 = vector.load %arg6[%c0_8, %c0_9] : memref<1x32xf32, #tpu.memory_space<vmem>>, vector<1x32xf32>
    %c0_10 = arith.constant 0 : index
    %c0_11 = arith.constant 0 : index
    %5 = vector.load %arg7[%c0_10, %c0_11] : memref<32x16xbf16, #tpu.memory_space<vmem>>, vector<32x16xbf16>
    %c0_12 = arith.constant 0 : index
    %c0_13 = arith.constant 0 : index
    %6 = vector.load %arg8[%c0_12, %c0_13] : memref<1x16xf32, #tpu.memory_space<vmem>>, vector<1x16xf32>
    %c0_14 = arith.constant 0 : index
    %c0_15 = arith.constant 0 : index
    %7 = vector.load %arg9[%c0_14, %c0_15] : memref<16x32xbf16, #tpu.memory_space<vmem>>, vector<16x32xbf16>
    %c0_16 = arith.constant 0 : index
    %c0_17 = arith.constant 0 : index
    %8 = vector.load %arg10[%c0_16, %c0_17] : memref<1x32xf32, #tpu.memory_space<vmem>>, vector<1x32xf32>
    %9 = vector.shape_cast %0 : vector<8x8x32xbf16> to vector<64x32xbf16>
    %cst = arith.constant dense<0.000000e+00> : vector<64x16xf32>
    %10 = tpu.matmul %9, %1, %cst {dimension_numbers = #tpu.dot_dimension_numbers<[1], [0], [0], [1], [0, 0, 1, 1], [], []>} : vector<64x32xbf16>, vector<32x16xbf16>, vector<64x16xf32> -> vector<64x16xf32>
    %11 = vector.broadcast %2 : vector<1x16xf32> to vector<64x16xf32>
    %12 = arith.addf %10, %11 : vector<64x16xf32>
    %cst_18 = arith.constant 0.000000e+00 : f32
    %13 = vector.broadcast %cst_18 : f32 to vector<64x16xf32>
    %14 = arith.maximumf %12, %13 : vector<64x16xf32>
    %15 = arith.truncf %14 : vector<64x16xf32> to vector<64x16xbf16>
    %cst_19 = arith.constant dense<0.000000e+00> : vector<64x32xf32>
    %16 = tpu.matmul %15, %3, %cst_19 {dimension_numbers = #tpu.dot_dimension_numbers<[1], [0], [0], [1], [0, 0, 1, 1], [], []>} : vector<64x16xbf16>, vector<16x32xbf16>, vector<64x32xf32> -> vector<64x32xf32>
    %17 = vector.broadcast %4 : vector<1x32xf32> to vector<64x32xf32>
    %18 = arith.addf %16, %17 : vector<64x32xf32>
    %19 = vector.shape_cast %18 : vector<64x32xf32> to vector<8x8x32xf32>
    %20 = tpu.iota {dimensions = array<i32: 1>} : vector<8x8xi32>
    %c0_20 = arith.constant 0 : index
    %c0_21 = arith.constant 0 : index
    %21 = vector.load %arg2[%c0_20, %c0_21] : memref<8x1xi32, #tpu.memory_space<vmem>>, vector<8x1xi32>
    %22 = vector.broadcast %21 : vector<8x1xi32> to vector<8x8xi32>
    %23 = arith.cmpi slt, %20, %22 : vector<8x8xi32>
    %24 = vector.shape_cast %6 : vector<1x16xf32> to vector<1x16xf32>
    %25 = vector.broadcast %24 : vector<1x16xf32> to vector<8x16xf32>
    %26 = vector.shape_cast %8 : vector<1x32xf32> to vector<1x32xf32>
    %27 = vector.broadcast %26 : vector<1x32xf32> to vector<8x32xf32>
    %cst_22 = arith.constant 0.000000e+00 : f32
    %28 = vector.broadcast %cst_22 : f32 to vector<8x32xf32>
    %29 = arith.truncf %28 : vector<8x32xf32> to vector<8x32xbf16>
    %cst_23 = arith.constant dense<0.000000e+00> : vector<8x16xf32>
    %30 = tpu.matmul %29, %5, %cst_23 {dimension_numbers = #tpu.dot_dimension_numbers<[1], [0], [0], [1], [0, 0, 1, 1], [], []>} : vector<8x32xbf16>, vector<32x16xbf16>, vector<8x16xf32> -> vector<8x16xf32>
    %31 = arith.addf %30, %25 : vector<8x16xf32>
    %cst_24 = arith.constant 0.000000e+00 : f32
    %32 = vector.broadcast %cst_24 : f32 to vector<8x16xf32>
    %33 = arith.maximumf %31, %32 : vector<8x16xf32>
    %34 = arith.truncf %33 : vector<8x16xf32> to vector<8x16xbf16>
    %cst_25 = arith.constant dense<0.000000e+00> : vector<8x32xf32>
    %35 = tpu.matmul %34, %7, %cst_25 {dimension_numbers = #tpu.dot_dimension_numbers<[1], [0], [0], [1], [0, 0, 1, 1], [], []>} : vector<8x16xbf16>, vector<16x32xbf16>, vector<8x32xf32> -> vector<8x32xf32>
    %36 = arith.addf %35, %27 : vector<8x32xf32>
    %37 = vector.extract_strided_slice %19 {offsets = [0, 0, 0], sizes = [8, 1, 32], strides = [1, 1, 1]} : vector<8x8x32xf32> to vector<8x1x32xf32>
    %38 = vector.shape_cast %37 : vector<8x1x32xf32> to vector<8x32xf32>
    %39 = arith.addf %38, %36 : vector<8x32xf32>
    %40 = math.tanh %39 : vector<8x32xf32>
    %41 = vector.extract_strided_slice %23 {offsets = [0, 0], sizes = [8, 1], strides = [1, 1]} : vector<8x8xi1> to vector<8x1xi1>
    %42 = vector.shape_cast %41 : vector<8x1xi1> to vector<8x1xi1>
    %43 = vector.broadcast %42 : vector<8x1xi1> to vector<8x32xi1>
    %44 = arith.select %43, %40, %28 : vector<8x32xi1>, vector<8x32xf32>
    %45 = arith.truncf %44 : vector<8x32xf32> to vector<8x32xbf16>
    %cst_26 = arith.constant dense<0.000000e+00> : vector<8x16xf32>
    %46 = tpu.matmul %45, %5, %cst_26 {dimension_numbers = #tpu.dot_dimension_numbers<[1], [0], [0], [1], [0, 0, 1, 1], [], []>} : vector<8x32xbf16>, vector<32x16xbf16>, vector<8x16xf32> -> vector<8x16xf32>
    %47 = arith.addf %46, %25 : vector<8x16xf32>
    %cst_27 = arith.constant 0.000000e+00 : f32
    %48 = vector.broadcast %cst_27 : f32 to vector<8x16xf32>
    %49 = arith.maximumf %47, %48 : vector<8x16xf32>
    %50 = arith.truncf %49 : vector<8x16xf32> to vector<8x16xbf16>
    %cst_28 = arith.constant dense<0.000000e+00> : vector<8x32xf32>
    %51 = tpu.matmul %50, %7, %cst_28 {dimension_numbers = #tpu.dot_dimension_numbers<[1], [0], [0], [1], [0, 0, 1, 1], [], []>} : vector<8x16xbf16>, vector<16x32xbf16>, vector<8x32xf32> -> vector<8x32xf32>
    %52 = arith.addf %51, %27 : vector<8x32xf32>
    %53 = vector.extract_strided_slice %19 {offsets = [0, 1, 0], sizes = [8, 1, 32], strides = [1, 1, 1]} : vector<8x8x32xf32> to vector<8x1x32xf32>
    %54 = vector.shape_cast %53 : vector<8x1x32xf32> to vector<8x32xf32>
    %55 = arith.addf %54, %52 : vector<8x32xf32>
    %56 = math.tanh %55 : vector<8x32xf32>
    %57 = vector.extract_strided_slice %23 {offsets = [0, 1], sizes = [8, 1], strides = [1, 1]} : vector<8x8xi1> to vector<8x1xi1>
    %58 = vector.shape_cast %57 : vector<8x1xi1> to vector<8x1xi1>
    %59 = vector.broadcast %58 : vector<8x1xi1> to vector<8x32xi1>
    %60 = arith.select %59, %56, %44 : vector<8x32xi1>, vector<8x32xf32>
    %61 = arith.truncf %60 : vector<8x32xf32> to vector<8x32xbf16>
    %cst_29 = arith.constant dense<0.000000e+00> : vector<8x16xf32>
    %62 = tpu.matmul %61, %5, %cst_29 {dimension_numbers = #tpu.dot_dimension_numbers<[1], [0], [0], [1], [0, 0, 1, 1], [], []>} : vector<8x32xbf16>, vector<32x16xbf16>, vector<8x16xf32> -> vector<8x16xf32>
    %63 = arith.addf %62, %25 : vector<8x16xf32>
    %cst_30 = arith.constant 0.000000e+00 : f32
    %64 = vector.broadcast %cst_30 : f32 to vector<8x16xf32>
    %65 = arith.maximumf %63, %64 : vector<8x16xf32>
    %66 = arith.truncf %65 : vector<8x16xf32> to vector<8x16xbf16>
    %cst_31 = arith.constant dense<0.000000e+00> : vector<8x32xf32>
    %67 = tpu.matmul %66, %7, %cst_31 {dimension_numbers = #tpu.dot_dimension_numbers<[1], [0], [0], [1], [0, 0, 1, 1], [], []>} : vector<8x16xbf16>, vector<16x32xbf16>, vector<8x32xf32> -> vector<8x32xf32>
    %68 = arith.addf %67, %27 : vector<8x32xf32>
    %69 = vector.extract_strided_slice %19 {offsets = [0, 2, 0], sizes = [8, 1, 32], strides = [1, 1, 1]} : vector<8x8x32xf32> to vector<8x1x32xf32>
    %70 = vector.shape_cast %69 : vector<8x1x32xf32> to vector<8x32xf32>
    %71 = arith.addf %70, %68 : vector<8x32xf32>
    %72 = math.tanh %71 : vector<8x32xf32>
    %73 = vector.extract_strided_slice %23 {offsets = [0, 2], sizes = [8, 1], strides = [1, 1]} : vector<8x8xi1> to vector<8x1xi1>
    %74 = vector.shape_cast %73 : vector<8x1xi1> to vector<8x1xi1>
    %75 = vector.broadcast %74 : vector<8x1xi1> to vector<8x32xi1>
    %76 = arith.select %75, %72, %60 : vector<8x32xi1>, vector<8x32xf32>
    %77 = arith.truncf %76 : vector<8x32xf32> to vector<8x32xbf16>
    %cst_32 = arith.constant dense<0.000000e+00> : vector<8x16xf32>
    %78 = tpu.matmul %77, %5, %cst_32 {dimension_numbers = #tpu.dot_dimension_numbers<[1], [0], [0], [1], [0, 0, 1, 1], [], []>} : vector<8x32xbf16>, vector<32x16xbf16>, vector<8x16xf32> -> vector<8x16xf32>
    %79 = arith.addf %78, %25 : vector<8x16xf32>
    %cst_33 = arith.constant 0.000000e+00 : f32
    %80 = vector.broadcast %cst_33 : f32 to vector<8x16xf32>
    %81 = arith.maximumf %79, %80 : vector<8x16xf32>
    %82 = arith.truncf %81 : vector<8x16xf32> to vector<8x16xbf16>
    %cst_34 = arith.constant dense<0.000000e+00> : vector<8x32xf32>
    %83 = tpu.matmul %82, %7, %cst_34 {dimension_numbers = #tpu.dot_dimension_numbers<[1], [0], [0], [1], [0, 0, 1, 1], [], []>} : vector<8x16xbf16>, vector<16x32xbf16>, vector<8x32xf32> -> vector<8x32xf32>
    %84 = arith.addf %83, %27 : vector<8x32xf32>
    %85 = vector.extract_strided_slice %19 {offsets = [0, 3, 0], sizes = [8, 1, 32], strides = [1, 1, 1]} : vector<8x8x32xf32> to vector<8x1x32xf32>
    %86 = vector.shape_cast %85 : vector<8x1x32xf32> to vector<8x32xf32>
    %87 = arith.addf %86, %84 : vector<8x32xf32>
    %88 = math.tanh %87 : vector<8x32xf32>
    %89 = vector.extract_strided_slice %23 {offsets = [0, 3], sizes = [8, 1], strides = [1, 1]} : vector<8x8xi1> to vector<8x1xi1>
    %90 = vector.shape_cast %89 : vector<8x1xi1> to vector<8x1xi1>
    %91 = vector.broadcast %90 : vector<8x1xi1> to vector<8x32xi1>
    %92 = arith.select %91, %88, %76 : vector<8x32xi1>, vector<8x32xf32>
    %93 = arith.truncf %92 : vector<8x32xf32> to vector<8x32xbf16>
    %cst_35 = arith.constant dense<0.000000e+00> : vector<8x16xf32>
    %94 = tpu.matmul %93, %5, %cst_35 {dimension_numbers = #tpu.dot_dimension_numbers<[1], [0], [0], [1], [0, 0, 1, 1], [], []>} : vector<8x32xbf16>, vector<32x16xbf16>, vector<8x16xf32> -> vector<8x16xf32>
    %95 = arith.addf %94, %25 : vector<8x16xf32>
    %cst_36 = arith.constant 0.000000e+00 : f32
    %96 = vector.broadcast %cst_36 : f32 to vector<8x16xf32>
    %97 = arith.maximumf %95, %96 : vector<8x16xf32>
    %98 = arith.truncf %97 : vector<8x16xf32> to vector<8x16xbf16>
    %cst_37 = arith.constant dense<0.000000e+00> : vector<8x32xf32>
    %99 = tpu.matmul %98, %7, %cst_37 {dimension_numbers = #tpu.dot_dimension_numbers<[1], [0], [0], [1], [0, 0, 1, 1], [], []>} : vector<8x16xbf16>, vector<16x32xbf16>, vector<8x32xf32> -> vector<8x32xf32>
    %100 = arith.addf %99, %27 : vector<8x32xf32>
    %101 = vector.extract_strided_slice %19 {offsets = [0, 4, 0], sizes = [8, 1, 32], strides = [1, 1, 1]} : vector<8x8x32xf32> to vector<8x1x32xf32>
    %102 = vector.shape_cast %101 : vector<8x1x32xf32> to vector<8x32xf32>
    %103 = arith.addf %102, %100 : vector<8x32xf32>
    %104 = math.tanh %103 : vector<8x32xf32>
    %105 = vector.extract_strided_slice %23 {offsets = [0, 4], sizes = [8, 1], strides = [1, 1]} : vector<8x8xi1> to vector<8x1xi1>
    %106 = vector.shape_cast %105 : vector<8x1xi1> to vector<8x1xi1>
    %107 = vector.broadcast %106 : vector<8x1xi1> to vector<8x32xi1>
    %108 = arith.select %107, %104, %92 : vector<8x32xi1>, vector<8x32xf32>
    %109 = arith.truncf %108 : vector<8x32xf32> to vector<8x32xbf16>
    %cst_38 = arith.constant dense<0.000000e+00> : vector<8x16xf32>
    %110 = tpu.matmul %109, %5, %cst_38 {dimension_numbers = #tpu.dot_dimension_numbers<[1], [0], [0], [1], [0, 0, 1, 1], [], []>} : vector<8x32xbf16>, vector<32x16xbf16>, vector<8x16xf32> -> vector<8x16xf32>
    %111 = arith.addf %110, %25 : vector<8x16xf32>
    %cst_39 = arith.constant 0.000000e+00 : f32
    %112 = vector.broadcast %cst_39 : f32 to vector<8x16xf32>
    %113 = arith.maximumf %111, %112 : vector<8x16xf32>
    %114 = arith.truncf %113 : vector<8x16xf32> to vector<8x16xbf16>
    %cst_40 = arith.constant dense<0.000000e+00> : vector<8x32xf32>
    %115 = tpu.matmul %114, %7, %cst_40 {dimension_numbers = #tpu.dot_dimension_numbers<[1], [0], [0], [1], [0, 0, 1, 1], [], []>} : vector<8x16xbf16>, vector<16x32xbf16>, vector<8x32xf32> -> vector<8x32xf32>
    %116 = arith.addf %115, %27 : vector<8x32xf32>
    %117 = vector.extract_strided_slice %19 {offsets = [0, 5, 0], sizes = [8, 1, 32], strides = [1, 1, 1]} : vector<8x8x32xf32> to vector<8x1x32xf32>
    %118 = vector.shape_cast %117 : vector<8x1x32xf32> to vector<8x32xf32>
    %119 = arith.addf %118, %116 : vector<8x32xf32>
    %120 = math.tanh %119 : vector<8x32xf32>
    %121 = vector.extract_strided_slice %23 {offsets = [0, 5], sizes = [8, 1], strides = [1, 1]} : vector<8x8xi1> to vector<8x1xi1>
    %122 = vector.shape_cast %121 : vector<8x1xi1> to vector<8x1xi1>
    %123 = vector.broadcast %122 : vector<8x1xi1> to vector<8x32xi1>
    %124 = arith.select %123, %120, %108 : vector<8x32xi1>, vector<8x32xf32>
    %125 = arith.truncf %124 : vector<8x32xf32> to vector<8x32xbf16>
    %cst_41 = arith.constant dense<0.000000e+00> : vector<8x16xf32>
    %126 = tpu.matmul %125, %5, %cst_41 {dimension_numbers = #tpu.dot_dimension_numbers<[1], [0], [0], [1], [0, 0, 1, 1], [], []>} : vector<8x32xbf16>, vector<32x16xbf16>, vector<8x16xf32> -> vector<8x16xf32>
    %127 = arith.addf %126, %25 : vector<8x16xf32>
    %cst_42 = arith.constant 0.000000e+00 : f32
    %128 = vector.broadcast %cst_42 : f32 to vector<8x16xf32>
    %129 = arith.maximumf %127, %128 : vector<8x16xf32>
    %130 = arith.truncf %129 : vector<8x16xf32> to vector<8x16xbf16>
    %cst_43 = arith.constant dense<0.000000e+00> : vector<8x32xf32>
    %131 = tpu.matmul %130, %7, %cst_43 {dimension_numbers = #tpu.dot_dimension_numbers<[1], [0], [0], [1], [0, 0, 1, 1], [], []>} : vector<8x16xbf16>, vector<16x32xbf16>, vector<8x32xf32> -> vector<8x32xf32>
    %132 = arith.addf %131, %27 : vector<8x32xf32>
    %133 = vector.extract_strided_slice %19 {offsets = [0, 6, 0], sizes = [8, 1, 32], strides = [1, 1, 1]} : vector<8x8x32xf32> to vector<8x1x32xf32>
    %134 = vector.shape_cast %133 : vector<8x1x32xf32> to vector<8x32xf32>
    %135 = arith.addf %134, %132 : vector<8x32xf32>
    %136 = math.tanh %135 : vector<8x32xf32>
    %137 = vector.extract_strided_slice %23 {offsets = [0, 6], sizes = [8, 1], strides = [1, 1]} : vector<8x8xi1> to vector<8x1xi1>
    %138 = vector.shape_cast %137 : vector<8x1xi1> to vector<8x1xi1>
    %139 = vector.broadcast %138 : vector<8x1xi1> to vector<8x32xi1>
    %140 = arith.select %139, %136, %124 : vector<8x32xi1>, vector<8x32xf32>
    %141 = arith.truncf %140 : vector<8x32xf32> to vector<8x32xbf16>
    %cst_44 = arith.constant dense<0.000000e+00> : vector<8x16xf32>
    %142 = tpu.matmul %141, %5, %cst_44 {dimension_numbers = #tpu.dot_dimension_numbers<[1], [0], [0], [1], [0, 0, 1, 1], [], []>} : vector<8x32xbf16>, vector<32x16xbf16>, vector<8x16xf32> -> vector<8x16xf32>
    %143 = arith.addf %142, %25 : vector<8x16xf32>
    %cst_45 = arith.constant 0.000000e+00 : f32
    %144 = vector.broadcast %cst_45 : f32 to vector<8x16xf32>
    %145 = arith.maximumf %143, %144 : vector<8x16xf32>
    %146 = arith.truncf %145 : vector<8x16xf32> to vector<8x16xbf16>
    %cst_46 = arith.constant dense<0.000000e+00> : vector<8x32xf32>
    %147 = tpu.matmul %146, %7, %cst_46 {dimension_numbers = #tpu.dot_dimension_numbers<[1], [0], [0], [1], [0, 0, 1, 1], [], []>} : vector<8x16xbf16>, vector<16x32xbf16>, vector<8x32xf32> -> vector<8x32xf32>
    %148 = arith.addf %147, %27 : vector<8x32xf32>
    %149 = vector.extract_strided_slice %19 {offsets = [0, 7, 0], sizes = [8, 1, 32], strides = [1, 1, 1]} : vector<8x8x32xf32> to vector<8x1x32xf32>
    %150 = vector.shape_cast %149 : vector<8x1x32xf32> to vector<8x32xf32>
    %151 = arith.addf %150, %148 : vector<8x32xf32>
    %152 = math.tanh %151 : vector<8x32xf32>
    %153 = vector.extract_strided_slice %23 {offsets = [0, 7], sizes = [8, 1], strides = [1, 1]} : vector<8x8xi1> to vector<8x1xi1>
    %154 = vector.shape_cast %153 : vector<8x1xi1> to vector<8x1xi1>
    %155 = vector.broadcast %154 : vector<8x1xi1> to vector<8x32xi1>
    %156 = arith.select %155, %152, %140 : vector<8x32xi1>, vector<8x32xf32>
    %157 = tpu.concatenate %44, %60, %76, %92, %108, %124, %140, %156 in 1 : vector<8x32xf32>, vector<8x32xf32>, vector<8x32xf32>, vector<8x32xf32>, vector<8x32xf32>, vector<8x32xf32>, vector<8x32xf32>, vector<8x32xf32> -> vector<8x256xf32>
    %c0_47 = arith.constant 0 : index
    %c0_48 = arith.constant 0 : index
    %158 = vector.load %arg11[%c0_47, %c0_48] : memref<8x256xf32, #tpu.memory_space<vmem>>, vector<8x256xf32>
    tpu.vector_store %arg11[%c0_47, %c0_48], %157 {strides = array<i32>} : memref<8x256xf32, #tpu.memory_space<vmem>>, vector<8x256xf32>,
    return
  }
  func.func @transform_0(%arg0: i32) -> (i32, i32, i32) {
    %c0_i32 = arith.constant 0 : i32
    %c0_i32_0 = arith.constant 0 : i32
    %c0_i32_1 = arith.constant 0 : i32
    return %arg0, %c0_i32, %c0_i32_0 : i32, i32, i32
  }
  func.func @transform_1(%arg0: i32) -> (i32, i32) {
    %c0_i32 = arith.constant 0 : i32
    %c0_i32_0 = arith.constant 0 : i32
    return %arg0, %c0_i32 : i32, i32
  }
  func.func @transform_2(%arg0: i32) -> (i32, i32) {
    %c0_i32 = arith.constant 0 : i32
    %c0_i32_0 = arith.constant 0 : i32
    %c0_i32_1 = arith.constant 0 : i32
    return %c0_i32, %c0_i32_0 : i32, i32
  }
  func.func @transform_3(%arg0: i32) -> (i32, i32) {
    %c0_i32 = arith.constant 0 : i32
    %c0_i32_0 = arith.constant 0 : i32
    %c0_i32_1 = arith.constant 0 : i32
    return %c0_i32, %c0_i32_0 : i32, i32
  }
  func.func @transform_4(%arg0: i32) -> (i32, i32) {
    %c0_i32 = arith.constant 0 : i32
    %c0_i32_0 = arith.constant 0 : i32
    %c0_i32_1 = arith.constant 0 : i32
    return %c0_i32, %c0_i32_0 : i32, i32
  }
  func.func @transform_5(%arg0: i32) -> (i32, i32) {
    %c0_i32 = arith.constant 0 : i32
    %c0_i32_0 = arith.constant 0 : i32
    %c0_i32_1 = arith.constant 0 : i32
    return %c0_i32, %c0_i32_0 : i32, i32
  }
  func.func @transform_6(%arg0: i32) -> (i32, i32) {
    %c0_i32 = arith.constant 0 : i32
    %c0_i32_0 = arith.constant 0 : i32
    %c0_i32_1 = arith.constant 0 : i32
    return %c0_i32, %c0_i32_0 : i32, i32
  }
  func.func @transform_7(%arg0: i32) -> (i32, i32) {
    %c0_i32 = arith.constant 0 : i32
    %c0_i32_0 = arith.constant 0 : i32
    %c0_i32_1 = arith.constant 0 : i32
    return %c0_i32, %c0_i32_0 : i32, i32
  }
  func.func @transform_8(%arg0: i32) -> (i32, i32) {
    %c0_i32 = arith.constant 0 : i32
    %c0_i32_0 = arith.constant 0 : i32
    %c0_i32_1 = arith.constant 0 : i32
    return %c0_i32, %c0_i32_0 : i32, i32
  }
  func.func @transform_9(%arg0: i32) -> (i32, i32) {
    %c0_i32 = arith.constant 0 : i32
    %c0_i32_0 = arith.constant 0 : i32
    %c0_i32_1 = arith.constant 0 : i32
    return %c0_i32, %c0_i32_0 : i32, i32
  }
  func.func @transform_10(%arg0: i32) -> (i32, i32) {
    %c0_i32 = arith.constant 0 : i32
    %c0_i32_0 = arith.constant 0 : i32
    return %arg0, %c0_i32 : i32, i32
  }
}

</mosaic_0001>

<bundles_post_ra>
// kernel: tpu_custom_call.1
= control target key start
LH: loop header
LB: loop body
LE: loop exit
PB: predicated region body
PF: predicated region fallthrough
CT: control target
= control target key end

     0   :  { %15 = vsyncpa [#allocation3], 0  ;;  %s3238_s0 = inlined_call_operand.vmem [shape: bf16[16,8,32], index: 0, kind: input, shape index: {}]   ;;  %s3239_s1 = inlined_call_operand.vmem [shape: s32[16,1], index: 1, kind: input, shape index: {}]   ;;  %s3240_s2 = inlined_call_operand.vmem [shape: bf16[32,16], index: 2, kind: input, shape index: {}]   ;;  %s3241_s3 = inlined_call_operand.hbm [shape: f32[1,16], index: 3, kind: input, shape index: {}]   ;;  %s3242_s4 = inlined_call_operand.hbm [shape: bf16[16,32], index: 4, kind: input, shape index: {}]   ;;  %s3243_s5 = inlined_call_operand.vmem [shape: f32[1,32], index: 5, kind: input, shape index: {}]   ;;  %s3244_s6 = inlined_call_operand.vmem [shape: bf16[32,16], index: 6, kind: input, shape index: {}]   ;;  %s3245_s7 = inlined_call_operand.vmem [shape: f32[1,16], index: 7, kind: input, shape index: {}]   ;;  %s3246_s8 = inlined_call_operand.vmem [shape: bf16[16,32], index: 8, kind: input, shape index: {}]   ;;  %s3247_s9 = inlined_call_operand.vmem [shape: f32[1,32], index: 9, kind: input, shape index: {}]   ;;  %s3248_s10 = inlined_call_operand.hbm [shape: f32[16,256], index: 10, kind: output, shape index: {}]  }
   0x1   :  { %16 = vsyncpa [#allocation6], 0 }
   0x2   :  { %17 = vsyncpa [#allocation4], 0 }
   0x3   :  { %19 = vsyncpa [#allocation4 + $0x1], 0  ;;  %s2693_s13 = smov 0   ;;  %s2695_s14 = smov 0  }
   0x4   :  { %s2697_s15 = smov 0   ;;  %s2699_s16 = smov 0  }
   0x5 LB: > { %3253 = sst [smem:[#allocation11_spill]] %s2614_s15  ;;  %s2714_s17 = sadd.s32 4294967295, %s2618_s16   ;;  %s2618_s16 = sphi %s2699_s16, %s3271_s16   ;;  %s2614_s15 = sphi %s2697_s15, %s3270_s15   ;;  %s2610_s14 = sphi %s2695_s14, %s3269_s14   ;;  %s2606_s13 = sphi %s2693_s13, %s3268_s13  }
   0x6   : > { %s2026_s18 = sadd.s32 4294967294, %s2618_s16   ;;  %s2718_s19 = sadd.s32 1, %s2618_s16  }
   0x7   : > { %s252_s20 = sadd.s32 1, %s2614_s15  ;;  %s249_s21 = ssub.s32 %s2618_s16, %s2718_s19 }
   0x8   : > { %p262_p0 = scmp.ne.s32.totalorder %s2614_s15, %s2610_s14  ;;  %p250_p1 = scmp.eq.s32.totalorder %s249_s21, 0 }
   0x9   : > { %p263_p2 = scmp.eq.s32.totalorder %s2714_s17, 1  ;;  %p268_p3 = scmp.ne.s32.totalorder %s2610_s14, %s2606_s13 }
   0xa   : > { %p269_p4 = scmp.eq.s32.totalorder %s2026_s18, 1  ;;  %p2027_p7 = scmp.ge.s32.totalorder %s2618_s16, 1 }
   0xb   : > { %s2729_s22 = scalar_select %p250_p1, %s2614_s15, %s252_s20  }
   0xc   : > { %p2731_p5 = por %p263_p2, %p262_p0  ;;  %p2735_p6 = por %p269_p4, %p268_p3 }
   0xd   : > { %3254 = sst [smem:[#allocation12_spill]] %s2729_s22  ;;  %p276_p8 = scmp.lt.s32.totalorder %s2618_s16, 3 }
   0xe   : > { %s3255_s23 = scalar_select %p2731_p5, 1, 0 }
   0xf   : > { %s3256_s24 = scalar_select %p2735_p6, 1, 0 }
  0x10   : > { %p3249_p9 = scmp.eq.s32.totalorder %s2714_s17, 0  ;;  %p2742_p10 = pnand %p2027_p7, %p276_p8 }
  0x11   : > { %s2620_s26 = smov [#allocation2]   ;;  %s2621_s28 = smov [#allocation5]  }
  0x12   : > { %s3257_s25 = scalar_select %p2742_p10, 1, 0 }
  0x13   : > { %s292_s27 = sshll.u32 %s2620_s26, 4  ;;  %p2276_p11 = pneg %p2742_p10  ;;  %s293_s27 = int_to_ptr.vmem [resolvable:$true] %s292_s27 }
  0x14   : > { %s302_s29 = sshll.u32 %s2621_s28, 4  ;;  %s2492_s18 = scalar_lea.hbm %s3241_s3, 16  ;;  %s2754_s29 = int_to_ptr.vmem [resolvable:$true] %s302_s29 }
  0x15   : > { %p2750_p12 = pnand %p3249_p9, %p2276_p11  ;;  %p2493_p13 = scmp.ne.s32.totalorder %s3241_s3, %s2492_s18 }
  0x16   : > { %p2499_p3 = scmp.lt.u32.totalorder %s2492_s18, %s3241_s3 }
  0x17   : > { %p2494_p0 = pneg %p2750_p12 }
  0x19   : > { %p2495_p1 = pnand %p2494_p0, %p2493_p13 }
  0x1b   : > { %p2496_p2 = pneg %p2495_p1 }
  0x1d   : > { %p2501_p4 = pnand %p2499_p3, %p2496_p2 }
  0x1f   : > { %2504 = shalt.err (!%p2501_p4)
}
  0x20   : > { %s2505_s22 = scalar_lea.vmem %s293_s27, 16  ;;  %s2512_s11 = scalar_lea.vmem %s293_s27, 32 }
  0x21   : > { %p2506_p7 = scmp.ne.s32.totalorder %s293_s27, %s2505_s22  ;;  %p2513_p9 = scmp.lt.s32.totalorder %s293_s27, %s293_s27 }
  0x22   : > { %p2514_p6 = scmp.lt.s32.totalorder %s2512_s11, %s2505_s22 }
  0x23   : > { %p2508_p8 = pnand %p2506_p7, %p2494_p0 }
  0x24   : > { %p2515_p5 = por %p2514_p6, %p2513_p9 }
  0x25   : > { %p2509_p11 = pneg %p2508_p8 }
  0x27   : > { %p2516_p10 = pnand %p2515_p5, %p2509_p11 }
  0x29   : > { %2519 = shalt.err (!%p2516_p10)
}
  0x2a   : > { %2279 = dma.hbm_to_vmem [thread:$0]  (!%p2750_p12), %s3241_s3, 16, %s293_s27, [#allocation3]  }
  0x2b   : > { %s2520_s26 = scalar_lea.hbm %s3242_s4, 128 }
  0x2c   : > { %p2521_p13 = scmp.ne.s32.totalorder %s3242_s4, %s2520_s26  ;;  %p2527_p9 = scmp.lt.u32.totalorder %s2520_s26, %s3242_s4 }
  0x2e   : > { %p2523_p6 = pnand %p2521_p13, %p2494_p0 }
  0x30   : > { %p2524_p5 = pneg %p2523_p6 }
  0x32   : > { %p2529_p10 = pnand %p2527_p9, %p2524_p5 }
  0x34   : > { %2532 = shalt.err (!%p2529_p10)
}
  0x35   : > { %s2533_s27 = scalar_lea.vmem %s2754_s29, 128  ;;  %p2541_p4 = scmp.lt.s32.totalorder %s2754_s29, %s2754_s29 }
  0x36   : > { %p2534_p1 = scmp.ne.s32.totalorder %s2754_s29, %s2533_s27  ;;  %p2542_p7 = scmp.lt.s32.totalorder %s2533_s27, %s2533_s27 }
  0x38   : > { %p2536_p2 = pnand %p2534_p1, %p2494_p0  ;;  %p2543_p8 = por %p2542_p7, %p2541_p4 }
  0x3a   : > { %p2537_p3 = pneg %p2536_p2 }
  0x3c   : > { %p2544_p11 = pnand %p2543_p8, %p2537_p3 }
  0x3e   : > { %2547 = shalt.err (!%p2544_p11)
}
  0x3f   : > { %s2622_s15 = smov 64   ;;  %s2623_s12 = smov 4  }
  0x40   : > { %2282 = dma.hbm_to_vmem [thread:$0]  (!%p2750_p12), %s3242_s4, 128, %s2754_s29, [#allocation6], %s2622_s15, %s2622_s15, %s2623_s12  }
  0x41   : > { %p3259_p13 = scmp.ne.s32.totalorder %s3257_s25, 0 }
  0x42   : > { %p3260_p0 = scmp.eq.s32.totalorder (!%p3259_p13), %s2714_s17, 0 }
  0x43   : > { %349 = sbr.rel (%p3259_p13) target bundleno = 4131 (0x1023), region = 60 }
  0x4a   : > { %2593 = dma.done.wait (%p3260_p0), [#allocation3], 16   ;;  %p3261_p6 = pmov %p3260_p0 }
  0x4b   : > { %p3262_p5 = pmov %p3260_p0 }
  0x4c   : > { %2595 = vsyncadd (%p3261_p6), [#allocation3], 4294967280 }
  0x4d   : > { %2597 = dma.done.wait (%p3262_p5), [#allocation6], 128   ;;  %p3263_p9 = pmov %p3260_p0 }
  0x4e   : > { %s2035_s30 = sshll.u32 %s2714_s17, 3  ;;  %v2350_v0 = vld [vmem:[%s3240_s2] sm:$0xff]   ;;  %v2351_v1 = vld [vmem:[%s3240_s2 + $0x8] sm:$0xff]   ;;  %vm468_vm0 = vcmask 261120   ;;  %v2624_v7 = vmov 0.0   ;;  %vm2625_vm1 = vmmov 0   ;;  %v648_v41 = vlaneseq }
  0x4f   : > { %2599 = vsyncadd (%p3263_p9), [#allocation6], 4294967168  ;;  %p396_p10 = scmp.lt.s32.totalorder %s2035_s30, 15  ;;  %2132 = vmatprep.subr.bf16.mxu0 %v2350_v0  ;;  %v2356_v6 = vld [vmem:[#allocation5] sm:$0xff]   ;;  %v2626_v8 = vmov 0   ;;  %p401_p12 = scmp.lt.s32.totalorder %s2714_s17, 1 }
  0x50   : > { %2133 = vmatpush3.bf16.msra.mxu0 %v2350_v0  ;;  %2144 = vmatprep.subr.bf16.mxu1 %v2356_v6  ;;  %v2038_v10 = vld [vmem:[#allocation2] ss:$0 sm:$0xff]  ;;  %vm570_vm2 = vcmask 130048   ;;  %v2847_v34 = vld [vmem:[%s3244_s6 + $0x8] sm:$0xff]   ;;  %v649_v42 = vand.u32 127, %v648_v41  ;;  %v2627_v46 = vmov 1  }
  0x51   : > { %s3273_s30 = smov (!%p396_p10, %s2035_s30), 15  ;;  %2134 = vmatprep.subr.bf16.mxu0 %v2351_v1  ;;  %2145 = vmatpush3.bf16.msra.mxu1 %v2356_v6  ;;  %v2839_v26 = vld [vmem:[%s3244_s6] sm:$0xff]   ;;  %v2628_v47 = vmov 3   ;;  %v2629_v48 = vmov 2   ;;  %v2630_v49 = vmov 6   ;;  %v2631_v50 = vmov 4  }
  0x52   : > { %s2036_s29 = sshll.u32 %s3273_s30, 2  ;;  %2154 = vmatprep.subr.bf16.mxu1 %v2624_v7  ;;  %2341 = vset.pattern.permute.xlu0 %v2626_v8  ;;  %v2865_v45 = vld [vmem:[%s3246_s8] sm:$0xff]   ;;  %v2632_v51 = vmov 7   ;;  %v2633_v52 = vmov 5   ;;  %vm819_vm4 = vcmask 1041409   ;;  %vm822_vm5 = vcmask 1042434  }
  0x53   : > { %s399_s26 = scalar_lea.vmem %s3238_s0, %s2036_s29  ;;  %2342 = vset.pattern.permute.xlu1 %v2627_v46  ;;  %v2872_v61 = vld [vmem:[%s3245_s7] ss:$0 sm:$0xff]  ;;  %vm825_vm6 = vcmask 1043459   ;;  %vm828_vm7 = vcmask 1044484   ;;  %vm831_vm8 = vcmask 1045509   ;;  %vm834_vm9 = vcmask 1046534  }
  0x54   : > { %v2352_v2 = vld [vmem:[%s399_s26] sm:$0xff]   ;;  %v2353_v3 = vld [vmem:[%s399_s26 + $0x8] sm:$0xff]   ;;  %v2354_v4 = vld [vmem:[%s399_s26 + $0x10] sm:$0xff]   ;;  %2135 = vmatpush3.bf16.msra.mxu0 %v2351_v1  ;;  %s402_s15 = scalar_select %p401_p12, %s2714_s17, 1  ;;  %vm837_vm10 = vcmask 1047559   ;;  %vm1909_vm15 = vcmask 523264  }
  0x55   : > { %2136 = vmatprep.mubr.msk.bf16.mxu0 %vm468_vm0, %v2352_v2  ;;  %v2355_v5 = vld [vmem:[%s399_s26 + $0x18] sm:$0xff]   ;;  %2162 = vmatprep.subr.bf16.mxu0 %v2624_v7  ;;  %v2886_v6 = vld [vmem:[%s3247_s9] ss:$0 sm:$0xff]  ;;  %s2635_s29 = smov 64   ;;  %s2636_s21 = smov 96  }
  0x56   : > { %s2037_s12 = sshll.u32 %s402_s15, 3  ;;  %s392_s25 = sand.u32 1, %s2610_s14  }
  0x57   : > { %2137 = vmatmul.mubr.msk.bf16.vlgmr.msra.gmra.mrb[0].mxu0 %vm468_vm0, %v2353_v3  ;;  %s404_s30 = scalar_lea.vmem %s3239_s1, %s2037_s12  ;;  %s2034_s26 = sshll.u32 %s392_s25, 4 }
  0x58   : > { %2140 = vmatprep.mubr.msk.bf16.mxu0 %vm468_vm0, %v2354_v4  ;;  %v650_v9 = vld [vmem:[%s404_s30] sm:$0xff]  ;;  %2163 = vmatpush3.bf16.msra.mxu0 %v2865_v45  ;;  %s2634_s30 = smov 32   ;;  %s3052_s28 = scalar_lea.vmem [#allocation7], %s2034_s26 }
  0x59   : > { %652 = vperm.xlu0 %2341, %v650_v9   ;;  %2176 = vmatprep.subr.bf16.mxu0 %v2624_v7  ;;  %s2080_s26 = sshll.u32 %s2714_s17, 8  ;;  %s1919_s17 = scalar_lea.sflag [#allocation4], %s392_s25 }
  0x5a   : > { %s3192_s27 = scalar_lea.hbm %s3248_s10, %s2080_s26  ;;  %p3264_p2 = scmp.ne.s32.totalorder %s3255_s23, 0 }
  0x5b   : > { %s2637_s15 = smov [#allocation7]  }
  0x5c   : > { %s2552_s12 = sshll.u32 %s2637_s15, 4  ;;  %s2553_s12 = int_to_ptr.vmem [resolvable:$false] %s2552_s12 }
  0x5d   : > { %s2554_s20 = scalar_lea.vmem %s2553_s12, 512 }
  0x5f   : > { %2141 = vmatmul.mubr.msk.bf16.gmra.mrb[4].mxu0 %vm468_vm0, %v2355_v5  ;;  %v2049_v5 = vld [vmem:[%s3243_s5] ss:$0 sm:$0xff] }
  0x60   : > { %2164 = vmatprep.mubr.msk.bf16.mxu0 %vm2625_vm1, %v2624_v7 }
  0xd8   : > { %v653_v43 = vpop.permute.xlu0 %652 }
  0xd9   : > { %vm654_vm3 = vcmp.lt.s32.totalorder %v649_v42, %v653_v43 }
  0xda   : > { %v805_v44 = vsel %vm654_vm3, 1, %v2626_v8  ;;  %vm1911_vm3 = vcmask 785408  }
  0xdb   : > { %807 = vperm.xlu0 %2341, %v805_v44   ;;  %963 = vperm.xlu1 %2342, %v805_v44  }
  0xdf   : > { %2344 = vset.pattern.permute.xlu0 %v2628_v47  ;;  %2343 = vset.pattern.permute.xlu1 %v2629_v48 }
  0xe0   : > { %1261 = vperm.xlu0 %2344, %v805_v44   ;;  %1112 = vperm.xlu1 %2343, %v805_v44  }
  0xe4   : > { %2347 = vset.pattern.permute.xlu0 %v2630_v49  ;;  %2345 = vset.pattern.permute.xlu1 %v2631_v50 }
  0xe5   : > { %1708 = vperm.xlu0 %2347, %v805_v44   ;;  %1410 = vperm.xlu1 %2345, %v805_v44  }
  0xe9   : > { %2349 = vset.pattern.permute.xlu0 %v2632_v51  ;;  %2346 = vset.pattern.permute.xlu1 %v2633_v52 }
  0xea   : > { %1559 = vperm.xlu1 %2346, %v805_v44  }
  0xee   : > { %2348 = vset.pattern.permute.xlu1 %v2632_v51 }
  0xef   : > { %1857 = vperm.xlu1 %2348, %v805_v44  }
 0x12a   : > { %v2138_v11 = vpop.f32.mrb[0].mxu0 }
 0x12b   : > { %v524_v12 = vadd.f32 %v2138_v11, %v2038_v10  ;;  %v515_v13 = vpop.f32.mrb[1].mxu0 }
 0x12c   : > { %v516_v14 = vadd.f32 %v2038_v10, %v515_v13  ;;  %v2139_v15 = vpop.f32.mrb[2].mxu0 }
 0x12d   : > { %v527_v16 = vadd.f32 %v2139_v15, %v2038_v10  ;;  %v518_v17 = vpop.f32.mrb[3].mxu0  ;;  %v548_v19 = vmax.f32 %v524_v12, 0.0 }
 0x12e   : > { %v519_v18 = vadd.f32 %v2038_v10, %v518_v17  ;;  %v546_v21 = vmax.f32 %v516_v14, 0.0 }
 0x12f   : > { %v549_v20 = vmax.f32 %v527_v16, 0.0 }
 0x130   : > { %v547_v22 = vmax.f32 %v519_v18, 0.0 }
 0x131   : > { %v555_v23 = vpack.c.bf16 %v549_v20, %v548_v19 }
 0x132   : > { %v2142_v24 = vpop.f32.mrb[4].mxu0  ;;  %v554_v25 = vpack.c.bf16 %v547_v22, %v546_v21 }
 0x133   : > { %v540_v27 = vadd.f32 %v2142_v24, %v2038_v10  ;;  %v531_v28 = vpop.f32.mrb[5].mxu0 }
 0x134   : > { %v532_v29 = vadd.f32 %v2038_v10, %v531_v28  ;;  %v2143_v30 = vpop.f32.mrb[6].mxu0  ;;  %2146 = vmatprep.mubr.msk.bf16.mxu1 %vm570_vm2, %v554_v25 }
 0x135   : > { %v543_v31 = vadd.f32 %v2143_v30, %v2038_v10  ;;  %v534_v32 = vpop.f32.mrb[7].mxu0  ;;  %2147 = vmatmul.mubr.msk.bf16.vlgmr.msra.gmra.mrb[0].mxu1 %vm570_vm2, %v555_v23  ;;  %v552_v35 = vmax.f32 %v540_v27, 0.0 }
 0x136   : > { %v535_v33 = vadd.f32 %v2038_v10, %v534_v32  ;;  %2155 = vmatpush3.bf16.msra.mxu1 %v2839_v26  ;;  %v550_v37 = vmax.f32 %v532_v29, 0.0 }
 0x137   : > { %v553_v36 = vmax.f32 %v543_v31, 0.0  ;;  %2156 = vmatprep.subr.bf16.mxu1 %v2624_v7 }
 0x138   : > { %v551_v38 = vmax.f32 %v535_v33, 0.0 }
 0x139   : > { %v557_v39 = vpack.c.bf16 %v553_v36, %v552_v35 }
 0x13a   : > { %v556_v40 = vpack.c.bf16 %v551_v38, %v550_v37  ;;  %2157 = vmatpush3.bf16.msra.mxu1 %v2847_v34 }
 0x13b   : > { %2168 = vmatprep.subr.bf16.mxu1 %v2624_v7 }
 0x13c   : > { %2150 = vmatprep.mubr.msk.bf16.mxu1 %vm570_vm2, %v556_v40 }
 0x13d   : > { %2151 = vmatmul.mubr.msk.bf16.gmra.mrb[4].mxu1 %vm570_vm2, %v557_v39 }
 0x13e   : > { %2158 = vmatprep.mubr.msk.bf16.mxu1 %vm2625_vm1, %v2624_v7 }
 0x145   : > { %2159 = vmatmul.mubr.bf16.vlgmr.msra.gmra.mrb[8].mxu1 %v2626_v8 }
 0x146   : > { %2169 = vmatpush3.bf16.msra.mxu1 %v2839_v26  ;;  %2172 = vmatprep.mubr.msk.bf16.mxu1 %vm2625_vm1, %v2624_v7 }
 0x147   : > { %2170 = vmatprep.subr.bf16.mxu1 %v2624_v7 }
 0x14a   : > { %2171 = vmatpush3.bf16.msra.mxu1 %v2847_v34 }
 0x14b   : > { %2182 = vmatprep.subr.bf16.mxu1 %v2624_v7 }
 0x208   : > { %v2148_v53 = vpop.f32.mrb[0].mxu1 }
 0x209   : > { %v617_v54 = vpop.f32.mrb[1].mxu1  ;;  %v2891_v12 = vadd.f32 %v2148_v53, %v2049_v5 }
 0x20a   : > { %v2149_v55 = vpop.f32.mrb[2].mxu1  ;;  %v2888_v9 = vadd.f32 %v2049_v5, %v617_v54 }
 0x20b   : > { %v620_v56 = vpop.f32.mrb[3].mxu1  ;;  %v2893_v13 = vadd.f32 %v2149_v55, %v2049_v5  ;;  %v808_v55 = vpop.permute.xlu0 %807 }
 0x20c   : > { %v2895_v14 = vadd.f32 %v2049_v5, %v620_v56  ;;  %vm809_vm11 = vcmp.eq.s32.totalorder %v808_v55, 1 }
 0x210   : > { %v2152_v57 = vpop.f32.mrb[4].mxu1 }
 0x211   : > { %v633_v58 = vpop.f32.mrb[5].mxu1  ;;  %v2905_v31 = vadd.f32 %v2152_v57, %v2049_v5 }
 0x212   : > { %v2153_v59 = vpop.f32.mrb[6].mxu1  ;;  %v2897_v15 = vadd.f32 %v2049_v5, %v633_v58 }
 0x213   : > { %v636_v60 = vpop.f32.mrb[7].mxu1  ;;  %v2908_v33 = vadd.f32 %v2153_v59, %v2049_v5 }
 0x214   : > { %v2900_v22 = vadd.f32 %v2049_v5, %v636_v60 }
 0x218   : > { %v716_v62 = vpop.f32.mrb[8].mxu1 }
 0x219   : > { %v717_v63 = vadd.f32 %v2872_v61, %v716_v62  ;;  %v2160_v0 = vpop.f32.mrb[9].mxu1 }
 0x21a   : > { %v719_v1 = vpop.f32.mrb[10].mxu1 }
 0x21b   : > { %v722_v2 = vmax.f32 %v717_v63, 0.0  ;;  %v2161_v3 = vpop.f32.mrb[11].mxu1 }
 0x21d   : > { %v723_v4 = vpack.c.bf16 %v722_v2, %v722_v2 }
 0x21f   : > { %2165 = vmatmul.mubr.msk.bf16.vlgmr.msra.gmra.mrb[8].mxu0 %vm570_vm2, %v723_v4 }
 0x220   : > { %2177 = vmatpush3.bf16.msra.mxu0 %v2865_v45  ;;  %2178 = vmatprep.mubr.msk.bf16.mxu0 %vm2625_vm1, %v2624_v7 }
 0x221   : > { %2190 = vmatprep.subr.bf16.mxu0 %v2624_v7 }
 0x2f2   : > { %v767_v8 = vpop.f32.mrb[8].mxu0 }
 0x2f3   : > { %v768_v10 = vadd.f32 %v2886_v6, %v767_v8  ;;  %v2166_v11 = vpop.f32.mrb[9].mxu0 }
 0x2f4   : > { %v770_v16 = vpop.f32.mrb[10].mxu0 }
 0x2f5   : > { %v774_v17 = vrot.slane %v768_v10, 1  ;;  %v775_v18 = vrot.slane %v768_v10, 2  ;;  %v776_v19 = vrot.slane %v768_v10, 3  ;;  %v789_v20 = vadd.f32 %v768_v10, %v2888_v9  ;;  %v2167_v21 = vpop.f32.mrb[11].mxu0 }
 0x2f6   : > { %v777_v23 = vrot.slane %v768_v10, 4  ;;  %v778_v24 = vrot.slane %v768_v10, 5  ;;  %v779_v25 = vrot.slane %v768_v10, 6  ;;  %v780_v28 = vrot.slane %v768_v10, 7 }
 0x2f7   : > { %v790_v27 = vadd.f32 %v774_v17, %v2895_v14  ;;  %v791_v29 = vadd.f32 %v775_v18, %v2891_v12  ;;  %v792_v30 = vadd.f32 %v776_v19, %v2893_v13  ;;  %2360 = vtanh.f32 %v789_v20 }
 0x2f8   : > { %v793_v32 = vadd.f32 %v777_v23, %v2897_v15  ;;  %v794_v35 = vadd.f32 %v778_v24, %v2900_v22  ;;  %v795_v36 = vadd.f32 %v779_v25, %v2905_v31  ;;  %v796_v37 = vadd.f32 %v780_v28, %v2908_v33 }
 0x2f9   : > { %2362 = vtanh.f32 %v790_v27 }
 0x2fa   : > { %2364 = vtanh.f32 %v791_v29 }
 0x2fb   : > { %2366 = vtanh.f32 %v792_v30 }
 0x2fc   : > { %2368 = vtanh.f32 %v793_v32 }
 0x2fd   : > { %2370 = vtanh.f32 %v794_v35 }
 0x2fe   : > { %2372 = vtanh.f32 %v795_v36 }
 0x2ff   : > { %2374 = vtanh.f32 %v796_v37 }
 0x301   : > { %v2361_v38 = vpop.eup %2360 }
 0x303   : > { %v2363_v39 = vpop.eup %2362 }
 0x304   : > { %v2365_v40 = vpop.eup %2364  ;;  %v818_v41 = vrot.slane %v2363_v39, 7 }
 0x305   : > { %v2367_v42 = vpop.eup %2366  ;;  %v821_v43 = vrot.slane %v2365_v40, 6 }
 0x306   : > { %v2369_v44 = vpop.eup %2368  ;;  %v820_v46 = vsel %vm819_vm4, %v818_v41, %v2361_v38  ;;  %v824_v47 = vrot.slane %v2367_v42, 5 }
 0x307   : > { %v2371_v48 = vpop.eup %2370  ;;  %v823_v49 = vsel %vm822_vm5, %v821_v43, %v820_v46  ;;  %v827_v50 = vrot.slane %v2369_v44, 4 }
 0x308   : > { %v2373_v51 = vpop.eup %2372  ;;  %v826_v52 = vsel %vm825_vm6, %v824_v47, %v823_v49  ;;  %v830_v53 = vrot.slane %v2371_v48, 3 }
 0x309   : > { %v2375_v54 = vpop.eup %2374  ;;  %v829_v56 = vsel %vm828_vm7, %v827_v50, %v826_v52  ;;  %v833_v57 = vrot.slane %v2373_v51, 2 }
 0x30a   : > { %v832_v58 = vsel %vm831_vm8, %v830_v53, %v829_v56  ;;  %v836_v59 = vrot.slane %v2375_v54, 1 }
 0x30b   : > { %v835_v60 = vsel %vm834_vm9, %v833_v57, %v832_v58 }
 0x30c   : > { %v838_v62 = vsel %vm837_vm10, %v836_v59, %v835_v60 }
 0x30d   : > { %v2920_v63 = vsel %vm809_vm11, %v838_v62, 0.0  ;;  %v964_v62 = vpop.permute.xlu1 %963 }
 0x30e   : > { %v841_v0 = vpack.c.bf16 %v2920_v63, %v2920_v63  ;;  %vm965_vm12 = vcmp.eq.s32.totalorder %v964_v62, 1 }
 0x310   : > { %2173 = vmatmul.mubr.msk.bf16.vlgmr.msra.gmra.mrb[12].mxu1 %vm468_vm0, %v841_v0 }
 0x311   : > { %2183 = vmatpush3.bf16.msra.mxu1 %v2839_v26  ;;  %2186 = vmatprep.mubr.msk.bf16.mxu1 %vm2625_vm1, %v2624_v7 }
 0x312   : > { %2184 = vmatprep.subr.bf16.mxu1 %v2624_v7 }
 0x315   : > { %2185 = vmatpush3.bf16.msra.mxu1 %v2847_v34 }
 0x316   : > { %2196 = vmatprep.subr.bf16.mxu1 %v2624_v7 }
 0x3e3   : > { %v879_v1 = vpop.f32.mrb[12].mxu1 }
 0x3e4   : > { %v880_v2 = vadd.f32 %v2872_v61, %v879_v1  ;;  %v2174_v3 = vpop.f32.mrb[13].mxu1 }
 0x3e5   : > { %v882_v4 = vpop.f32.mrb[14].mxu1 }
 0x3e6   : > { %v885_v5 = vmax.f32 %v880_v2, 0.0  ;;  %v2175_v8 = vpop.f32.mrb[15].mxu1 }
 0x3e8   : > { %v886_v10 = vpack.c.bf16 %v885_v5, %v885_v5 }
 0x3ea   : > { %2179 = vmatmul.mubr.msk.bf16.vlgmr.msra.gmra.mrb[12].mxu0 %vm570_vm2, %v886_v10 }
 0x3eb   : > { %2191 = vmatpush3.bf16.msra.mxu0 %v2865_v45  ;;  %2192 = vmatprep.mubr.msk.bf16.mxu0 %vm2625_vm1, %v2624_v7 }
 0x3ec   : > { %2204 = vmatprep.subr.bf16.mxu0 %v2624_v7 }
 0x4bd   : > { %v924_v11 = vpop.f32.mrb[12].mxu0 }
 0x4be   : > { %v925_v16 = vadd.f32 %v2886_v6, %v924_v11  ;;  %v2180_v17 = vpop.f32.mrb[13].mxu0 }
 0x4bf   : > { %v927_v18 = vpop.f32.mrb[14].mxu0 }
 0x4c0   : > { %v947_v19 = vadd.f32 %v925_v16, %v2895_v14  ;;  %v2181_v20 = vpop.f32.mrb[15].mxu0  ;;  %v931_v21 = vrot.slane %v925_v16, 7  ;;  %v932_v23 = vrot.slane %v925_v16, 1  ;;  %v933_v24 = vrot.slane %v925_v16, 2 }
 0x4c1   : > { %v934_v25 = vrot.slane %v925_v16, 3  ;;  %v935_v27 = vrot.slane %v925_v16, 4  ;;  %v936_v28 = vrot.slane %v925_v16, 5  ;;  %v937_v29 = vrot.slane %v925_v16, 6 }
 0x4c2   : > { %v946_v30 = vadd.f32 %v931_v21, %v2888_v9  ;;  %v948_v32 = vadd.f32 %v932_v23, %v2891_v12  ;;  %v949_v35 = vadd.f32 %v933_v24, %v2893_v13  ;;  %2376 = vtanh.f32 %v947_v19 }
 0x4c3   : > { %v950_v36 = vadd.f32 %v934_v25, %v2897_v15  ;;  %v951_v37 = vadd.f32 %v935_v27, %v2900_v22  ;;  %v952_v38 = vadd.f32 %v936_v28, %v2905_v31  ;;  %v953_v39 = vadd.f32 %v937_v29, %v2908_v33 }
 0x4c4   : > { %2378 = vtanh.f32 %v946_v30 }
 0x4c5   : > { %2380 = vtanh.f32 %v948_v32 }
 0x4c6   : > { %2382 = vtanh.f32 %v949_v35 }
 0x4c7   : > { %2384 = vtanh.f32 %v950_v36 }
 0x4c8   : > { %2386 = vtanh.f32 %v951_v37 }
 0x4c9   : > { %2388 = vtanh.f32 %v952_v38 }
 0x4ca   : > { %2390 = vtanh.f32 %v953_v39 }
 0x4cc   : > { %v2377_v40 = vpop.eup %2376 }
 0x4ce   : > { %v2379_v41 = vpop.eup %2378 }
 0x4cf   : > { %v2381_v42 = vpop.eup %2380  ;;  %v974_v43 = vrot.slane %v2379_v41, 1 }
 0x4d0   : > { %v2383_v44 = vpop.eup %2382  ;;  %v976_v46 = vrot.slane %v2381_v42, 7 }
 0x4d1   : > { %v2385_v47 = vpop.eup %2384  ;;  %v975_v48 = vsel %vm819_vm4, %v2377_v40, %v974_v43  ;;  %v978_v49 = vrot.slane %v2383_v44, 6 }
 0x4d2   : > { %v2387_v50 = vpop.eup %2386  ;;  %v977_v51 = vsel %vm822_vm5, %v976_v46, %v975_v48  ;;  %v980_v52 = vrot.slane %v2385_v47, 5 }
 0x4d3   : > { %v2389_v53 = vpop.eup %2388  ;;  %v979_v54 = vsel %vm825_vm6, %v978_v49, %v977_v51  ;;  %v982_v55 = vrot.slane %v2387_v50, 4 }
 0x4d4   : > { %v2391_v56 = vpop.eup %2390  ;;  %v981_v57 = vsel %vm828_vm7, %v980_v52, %v979_v54  ;;  %v984_v58 = vrot.slane %v2389_v53, 3 }
 0x4d5   : > { %v983_v59 = vsel %vm831_vm8, %v982_v55, %v981_v57  ;;  %v986_v60 = vrot.slane %v2391_v56, 2 }
 0x4d6   : > { %v985_v0 = vsel %vm834_vm9, %v984_v58, %v983_v59 }
 0x4d7   : > { %v987_v1 = vsel %vm837_vm10, %v986_v60, %v985_v0 }
 0x4d8   : > { %v2954_v2 = vsel %vm965_vm12, %v987_v1, %v2920_v63 }
 0x4d9   : > { %1885 = vrot.lane.b32.xlu1 %v2954_v2, %s2634_s30  ;;  %v990_v3 = vpack.c.bf16 %v2954_v2, %v2954_v2 }
 0x4db   : > { %2187 = vmatmul.mubr.msk.bf16.vlgmr.msra.gmra.mrb[16].mxu1 %vm468_vm0, %v990_v3  ;;  %v1113_v3 = vpop.permute.xlu1 %1112 }
 0x4dc   : > { %2197 = vmatpush3.bf16.msra.mxu1 %v2839_v26  ;;  %2200 = vmatprep.mubr.msk.bf16.mxu1 %vm2625_vm1, %v2624_v7  ;;  %vm1114_vm13 = vcmp.eq.s32.totalorder %v1113_v3, 1 }
 0x4dd   : > { %2198 = vmatprep.subr.bf16.mxu1 %v2624_v7 }
 0x4e0   : > { %2199 = vmatpush3.bf16.msra.mxu1 %v2847_v34 }
 0x4e1   : > { %2210 = vmatprep.subr.bf16.mxu1 %v2624_v7 }
 0x5ae   : > { %v1028_v4 = vpop.f32.mrb[16].mxu1 }
 0x5af   : > { %v1029_v5 = vadd.f32 %v2872_v61, %v1028_v4  ;;  %v2188_v8 = vpop.f32.mrb[17].mxu1 }
 0x5b0   : > { %v1031_v10 = vpop.f32.mrb[18].mxu1 }
 0x5b1   : > { %v1034_v11 = vmax.f32 %v1029_v5, 0.0  ;;  %v2189_v16 = vpop.f32.mrb[19].mxu1 }
 0x5b3   : > { %v1035_v17 = vpack.c.bf16 %v1034_v11, %v1034_v11 }
 0x5b5   : > { %2193 = vmatmul.mubr.msk.bf16.vlgmr.msra.gmra.mrb[16].mxu0 %vm570_vm2, %v1035_v17 }
 0x5b6   : > { %2205 = vmatpush3.bf16.msra.mxu0 %v2865_v45  ;;  %2206 = vmatprep.mubr.msk.bf16.mxu0 %vm2625_vm1, %v2624_v7 }
 0x5b7   : > { %2218 = vmatprep.subr.bf16.mxu0 %v2624_v7 }
 0x688   : > { %v1073_v18 = vpop.f32.mrb[16].mxu0 }
 0x689   : > { %v1074_v19 = vadd.f32 %v2886_v6, %v1073_v18  ;;  %v2194_v20 = vpop.f32.mrb[17].mxu0 }
 0x68a   : > { %v1076_v21 = vpop.f32.mrb[18].mxu0 }
 0x68b   : > { %v1097_v23 = vadd.f32 %v1074_v19, %v2891_v12  ;;  %v2195_v24 = vpop.f32.mrb[19].mxu0  ;;  %v1080_v25 = vrot.slane %v1074_v19, 6  ;;  %v1081_v27 = vrot.slane %v1074_v19, 7  ;;  %v1082_v28 = vrot.slane %v1074_v19, 1 }
 0x68c   : > { %v1083_v29 = vrot.slane %v1074_v19, 2  ;;  %v1084_v30 = vrot.slane %v1074_v19, 3  ;;  %v1085_v32 = vrot.slane %v1074_v19, 4  ;;  %v1086_v35 = vrot.slane %v1074_v19, 5 }
 0x68d   : > { %v1095_v36 = vadd.f32 %v1080_v25, %v2888_v9  ;;  %v1096_v37 = vadd.f32 %v1081_v27, %v2895_v14  ;;  %v1098_v38 = vadd.f32 %v1082_v28, %v2893_v13  ;;  %2392 = vtanh.f32 %v1097_v23 }
 0x68e   : > { %v1099_v39 = vadd.f32 %v1083_v29, %v2897_v15  ;;  %v1100_v40 = vadd.f32 %v1084_v30, %v2900_v22  ;;  %v1101_v41 = vadd.f32 %v1085_v32, %v2905_v31  ;;  %v1102_v42 = vadd.f32 %v1086_v35, %v2908_v33 }
 0x68f   : > { %2394 = vtanh.f32 %v1095_v36 }
 0x690   : > { %2396 = vtanh.f32 %v1096_v37 }
 0x691   : > { %2398 = vtanh.f32 %v1098_v38 }
 0x692   : > { %2400 = vtanh.f32 %v1099_v39 }
 0x693   : > { %2402 = vtanh.f32 %v1100_v40 }
 0x694   : > { %2404 = vtanh.f32 %v1101_v41 }
 0x695   : > { %2406 = vtanh.f32 %v1102_v42 }
 0x697   : > { %v2393_v43 = vpop.eup %2392 }
 0x699   : > { %v2395_v44 = vpop.eup %2394 }
 0x69a   : > { %v2397_v46 = vpop.eup %2396  ;;  %v1123_v47 = vrot.slane %v2395_v44, 2 }
 0x69b   : > { %v2399_v48 = vpop.eup %2398  ;;  %v1124_v49 = vrot.slane %v2397_v46, 1 }
 0x69c   : > { %v2401_v50 = vpop.eup %2400  ;;  %v1127_v53 = vrot.slane %v2399_v48, 7 }
 0x69d   : > { %v2403_v51 = vpop.eup %2402  ;;  %v1125_v52 = vsel %vm819_vm4, %v1124_v49, %v1123_v47  ;;  %v1129_v56 = vrot.slane %v2401_v50, 6 }
 0x69e   : > { %v2405_v54 = vpop.eup %2404  ;;  %v1126_v55 = vsel %vm822_vm5, %v2393_v43, %v1125_v52  ;;  %v1131_v59 = vrot.slane %v2403_v51, 5 }
 0x69f   : > { %v2407_v57 = vpop.eup %2406  ;;  %v1128_v58 = vsel %vm825_vm6, %v1127_v53, %v1126_v55  ;;  %v1133_v62 = vrot.slane %v2405_v54, 4 }
 0x6a0   : > { %v1130_v60 = vsel %vm828_vm7, %v1129_v56, %v1128_v58  ;;  %v1135_v1 = vrot.slane %v2407_v57, 3 }
 0x6a1   : > { %v1132_v0 = vsel %vm831_vm8, %v1131_v59, %v1130_v60 }
 0x6a2   : > { %v1134_v4 = vsel %vm834_vm9, %v1133_v62, %v1132_v0 }
 0x6a3   : > { %v1136_v5 = vsel %vm837_vm10, %v1135_v1, %v1134_v4 }
 0x6a4   : > { %v2990_v8 = vsel %vm1114_vm13, %v1136_v5, %v2954_v2 }
 0x6a5   : > { %1889 = vrot.lane.b32.xlu1 %v2990_v8, %s2635_s29  ;;  %v1139_v10 = vpack.c.bf16 %v2990_v8, %v2990_v8 }
 0x6a7   : > { %2201 = vmatmul.mubr.msk.bf16.vlgmr.msra.gmra.mrb[20].mxu1 %vm468_vm0, %v1139_v10  ;;  %v1262_v10 = vpop.permute.xlu0 %1261 }
 0x6a8   : > { %2211 = vmatpush3.bf16.msra.mxu1 %v2839_v26  ;;  %2214 = vmatprep.mubr.msk.bf16.mxu1 %vm2625_vm1, %v2624_v7  ;;  %vm1263_vm14 = vcmp.eq.s32.totalorder %v1262_v10, 1 }
 0x6a9   : > { %2212 = vmatprep.subr.bf16.mxu1 %v2624_v7 }
 0x6ac   : > { %2213 = vmatpush3.bf16.msra.mxu1 %v2847_v34 }
 0x6ad   : > { %2224 = vmatprep.subr.bf16.mxu1 %v2624_v7 }
 0x77a   : > { %v1177_v2 = vpop.f32.mrb[20].mxu1 }
 0x77b   : > { %v1178_v11 = vadd.f32 %v2872_v61, %v1177_v2  ;;  %v2202_v16 = vpop.f32.mrb[21].mxu1 }
 0x77c   : > { %v1180_v17 = vpop.f32.mrb[22].mxu1 }
 0x77d   : > { %v1183_v18 = vmax.f32 %v1178_v11, 0.0  ;;  %v2203_v19 = vpop.f32.mrb[23].mxu1 }
 0x77f   : > { %v1184_v20 = vpack.c.bf16 %v1183_v18, %v1183_v18 }
 0x781   : > { %2207 = vmatmul.mubr.msk.bf16.vlgmr.msra.gmra.mrb[20].mxu0 %vm570_vm2, %v1184_v20 }
 0x782   : > { %2219 = vmatpush3.bf16.msra.mxu0 %v2865_v45  ;;  %2220 = vmatprep.mubr.msk.bf16.mxu0 %vm2625_vm1, %v2624_v7 }
 0x783   : > { %2232 = vmatprep.subr.bf16.mxu0 %v2624_v7 }
 0x854   : > { %v1222_v21 = vpop.f32.mrb[20].mxu0 }
 0x855   : > { %v1223_v23 = vadd.f32 %v2886_v6, %v1222_v21  ;;  %v2208_v24 = vpop.f32.mrb[21].mxu0 }
 0x856   : > { %v1225_v25 = vpop.f32.mrb[22].mxu0 }
 0x857   : > { %v1247_v27 = vadd.f32 %v1223_v23, %v2893_v13  ;;  %v2209_v28 = vpop.f32.mrb[23].mxu0  ;;  %v1229_v29 = vrot.slane %v1223_v23, 5  ;;  %v1230_v30 = vrot.slane %v1223_v23, 6  ;;  %v1231_v32 = vrot.slane %v1223_v23, 7 }
 0x858   : > { %v1232_v35 = vrot.slane %v1223_v23, 1  ;;  %v1233_v36 = vrot.slane %v1223_v23, 2  ;;  %v1234_v37 = vrot.slane %v1223_v23, 3  ;;  %v1235_v38 = vrot.slane %v1223_v23, 4 }
 0x859   : > { %v1244_v39 = vadd.f32 %v1229_v29, %v2888_v9  ;;  %v1245_v40 = vadd.f32 %v1230_v30, %v2895_v14  ;;  %v1246_v41 = vadd.f32 %v1231_v32, %v2891_v12  ;;  %2408 = vtanh.f32 %v1247_v27 }
 0x85a   : > { %v1248_v42 = vadd.f32 %v1232_v35, %v2897_v15  ;;  %v1249_v43 = vadd.f32 %v1233_v36, %v2900_v22  ;;  %v1250_v44 = vadd.f32 %v1234_v37, %v2905_v31  ;;  %v1251_v46 = vadd.f32 %v1235_v38, %v2908_v33 }
 0x85b   : > { %2410 = vtanh.f32 %v1244_v39 }
 0x85c   : > { %2412 = vtanh.f32 %v1245_v40 }
 0x85d   : > { %2414 = vtanh.f32 %v1246_v41 }
 0x85e   : > { %2416 = vtanh.f32 %v1248_v42 }
 0x85f   : > { %2418 = vtanh.f32 %v1249_v43 }
 0x860   : > { %2420 = vtanh.f32 %v1250_v44 }
 0x861   : > { %2422 = vtanh.f32 %v1251_v46 }
 0x863   : > { %v2409_v47 = vpop.eup %2408 }
 0x865   : > { %v2411_v48 = vpop.eup %2410 }
 0x866   : > { %v2413_v49 = vpop.eup %2412  ;;  %v1272_v50 = vrot.slane %v2411_v48, 3 }
 0x867   : > { %v2415_v51 = vpop.eup %2414  ;;  %v1273_v52 = vrot.slane %v2413_v49, 2 }
 0x868   : > { %v2417_v53 = vpop.eup %2416  ;;  %v1275_v54 = vrot.slane %v2415_v51, 1 }
 0x869   : > { %v2419_v55 = vpop.eup %2418  ;;  %v1274_v56 = vsel %vm819_vm4, %v1273_v52, %v1272_v50  ;;  %v1278_v59 = vrot.slane %v2417_v53, 7 }
 0x86a   : > { %v2421_v57 = vpop.eup %2420  ;;  %v1276_v58 = vsel %vm822_vm5, %v1275_v54, %v1274_v56  ;;  %v1280_v0 = vrot.slane %v2419_v55, 6 }
 0x86b   : > { %v2423_v60 = vpop.eup %2422  ;;  %v1277_v62 = vsel %vm825_vm6, %v2409_v47, %v1276_v58  ;;  %v1282_v3 = vrot.slane %v2421_v57, 5 }
 0x86c   : > { %v1279_v1 = vsel %vm828_vm7, %v1278_v59, %v1277_v62  ;;  %v1284_v5 = vrot.slane %v2423_v60, 4 }
 0x86d   : > { %v1281_v4 = vsel %vm831_vm8, %v1280_v0, %v1279_v1 }
 0x86e   : > { %v1283_v2 = vsel %vm834_vm9, %v1282_v3, %v1281_v4 }
 0x86f   : > { %v1285_v11 = vsel %vm837_vm10, %v1284_v5, %v1283_v2 }
 0x870   : > { %v3026_v16 = vsel %vm1263_vm14, %v1285_v11, %v2990_v8  ;;  %v3039_v8 = vpop.permute.xlu1 %1410 }
 0x871   : > { %1893 = vrot.lane.b32.xlu1 %v3026_v16, %s2636_s21  ;;  %v1288_v17 = vpack.c.bf16 %v3026_v16, %v3026_v16  ;;  %vm1412_vm11 = vcmp.eq.s32.totalorder %v3039_v8, 1 }
 0x873   : > { %2215 = vmatmul.mubr.msk.bf16.vlgmr.msra.gmra.mrb[24].mxu1 %vm468_vm0, %v1288_v17 }
 0x874   : > { %2225 = vmatpush3.bf16.msra.mxu1 %v2839_v26  ;;  %2228 = vmatprep.mubr.msk.bf16.mxu1 %vm2625_vm1, %v2624_v7  ;;  %v3041_v18 = vpop.permute.xlu1 %1559 }
 0x875   : > { %2226 = vmatprep.subr.bf16.mxu1 %v2624_v7  ;;  %vm1561_vm12 = vcmp.eq.s32.totalorder %v3041_v18, 1  ;;  %v2489_v18 = vld [vmem:[%s3244_s6 + $0x8] sm:$0xff]  }
 0x878   : > { %2227 = vmatpush3.bf16.msra.mxu1 %v2847_v34  ;;  %v3043_v19 = vpop.permute.xlu1 %1857 }
 0x879   : > { %2238 = vmatprep.subr.bf16.mxu1 %v2624_v7 }
 0x87c   : > { %v1886_v20 = vpop.permute.xlu1 %1885 }
 0x87d   : > { %v1908_v23 = vsel %vm468_vm0, %v2920_v63, %v1886_v20 }
 0x880   : > { %v1890_v21 = vpop.permute.xlu1 %1889 }
 0x881   : > { %v1910_v24 = vsel %vm1909_vm15, %v1908_v23, %v1890_v21 }
 0x8e3   : > { %v1894_v25 = vpop.permute.xlu1 %1893 }
 0x8e4   : > { %v1912_v27 = vsel %vm1911_vm3, %v1910_v24, %v1894_v25 }
 0x8e5   : > { %1916 = vst [vmem:[%s3052_s28] sm:$0xff] %v1912_v27 }
 0x946   : > { %v1326_v28 = vpop.f32.mrb[24].mxu1 }
 0x947   : > { %v1327_v29 = vadd.f32 %v2872_v61, %v1326_v28  ;;  %v2216_v30 = vpop.f32.mrb[25].mxu1 }
 0x948   : > { %v1329_v32 = vpop.f32.mrb[26].mxu1 }
 0x949   : > { %v1332_v35 = vmax.f32 %v1327_v29, 0.0  ;;  %v2217_v36 = vpop.f32.mrb[27].mxu1 }
 0x94b   : > { %v1333_v37 = vpack.c.bf16 %v1332_v35, %v1332_v35 }
 0x94d   : > { %2221 = vmatmul.mubr.msk.bf16.vlgmr.msra.gmra.mrb[24].mxu0 %vm570_vm2, %v1333_v37 }
 0x94e   : > { %2233 = vmatpush3.bf16.msra.mxu0 %v2865_v45  ;;  %2234 = vmatprep.mubr.msk.bf16.mxu0 %vm2625_vm1, %v2624_v7 }
 0x94f   : > { %2246 = vmatprep.subr.bf16.mxu0 %v2624_v7 }
 0xa20   : > { %v1371_v63 = vpop.f32.mrb[24].mxu0 }
 0xa21   : > { %v1372_v38 = vadd.f32 %v2886_v6, %v1371_v63  ;;  %v2222_v39 = vpop.f32.mrb[25].mxu0 }
 0xa22   : > { %v1374_v40 = vpop.f32.mrb[26].mxu0 }
 0xa23   : > { %v1378_v41 = vrot.slane %v1372_v38, 4  ;;  %v1379_v42 = vrot.slane %v1372_v38, 5  ;;  %v1380_v43 = vrot.slane %v1372_v38, 6  ;;  %v1381_v44 = vrot.slane %v1372_v38, 7  ;;  %v2223_v46 = vpop.f32.mrb[27].mxu0 }
 0xa24   : > { %v1397_v47 = vadd.f32 %v1372_v38, %v2897_v15  ;;  %v1382_v48 = vrot.slane %v1372_v38, 1  ;;  %v1383_v49 = vrot.slane %v1372_v38, 2  ;;  %v1384_v53 = vrot.slane %v1372_v38, 3 }
 0xa25   : > { %v1393_v50 = vadd.f32 %v1378_v41, %v2888_v9  ;;  %v1394_v51 = vadd.f32 %v1379_v42, %v2895_v14  ;;  %v1395_v52 = vadd.f32 %v1380_v43, %v2891_v12  ;;  %v1396_v54 = vadd.f32 %v1381_v44, %v2893_v13 }
 0xa26   : > { %2424 = vtanh.f32 %v1397_v47  ;;  %v1398_v55 = vadd.f32 %v1382_v48, %v2900_v22  ;;  %v1399_v56 = vadd.f32 %v1383_v49, %v2905_v31  ;;  %v1400_v57 = vadd.f32 %v1384_v53, %v2908_v33 }
 0xa27   : > { %2426 = vtanh.f32 %v1393_v50 }
 0xa28   : > { %2428 = vtanh.f32 %v1394_v51 }
 0xa29   : > { %2430 = vtanh.f32 %v1395_v52 }
 0xa2a   : > { %2432 = vtanh.f32 %v1396_v54 }
 0xa2b   : > { %2434 = vtanh.f32 %v1398_v55 }
 0xa2c   : > { %2436 = vtanh.f32 %v1399_v56 }
 0xa2d   : > { %2438 = vtanh.f32 %v1400_v57 }
 0xa30   : > { %v2425_v58 = vpop.eup %2424 }
 0xa31   : > { %v2427_v59 = vpop.eup %2426 }
 0xa32   : > { %v2429_v60 = vpop.eup %2428  ;;  %v1421_v62 = vrot.slane %v2427_v59, 4 }
 0xa33   : > { %v2431_v0 = vpop.eup %2430  ;;  %v1422_v1 = vrot.slane %v2429_v60, 3 }
 0xa34   : > { %v2433_v3 = vpop.eup %2432  ;;  %v1424_v4 = vrot.slane %v2431_v0, 2 }
 0xa35   : > { %v2435_v5 = vpop.eup %2434  ;;  %v1423_v10 = vsel %vm819_vm4, %v1422_v1, %v1421_v62  ;;  %v1426_v2 = vrot.slane %v2433_v3, 1 }
 0xa36   : > { %v2437_v11 = vpop.eup %2436  ;;  %v1425_v17 = vsel %vm822_vm5, %v1424_v4, %v1423_v10  ;;  %v1429_v23 = vrot.slane %v2435_v5, 7 }
 0xa37   : > { %v2439_v20 = vpop.eup %2438  ;;  %v1427_v21 = vsel %vm825_vm6, %v1426_v2, %v1425_v17  ;;  %v1431_v25 = vrot.slane %v2437_v11, 6 }
 0xa38   : > { %v1428_v24 = vsel %vm828_vm7, %v2425_v58, %v1427_v21  ;;  %v1433_v28 = vrot.slane %v2439_v20, 5 }
 0xa39   : > { %v1430_v27 = vsel %vm831_vm8, %v1429_v23, %v1428_v24 }
 0xa3a   : > { %v1432_v29 = vsel %vm834_vm9, %v1431_v25, %v1430_v27 }
 0xa3b   : > { %v1434_v30 = vsel %vm837_vm10, %v1433_v28, %v1432_v29 }
 0xa3c   : > { %v3079_v32 = vsel %vm1412_vm11, %v1434_v30, %v3026_v16 }
 0xa3d   : > { %v1437_v35 = vpack.c.bf16 %v3079_v32, %v3079_v32 }
 0xa3f   : > { %2229 = vmatmul.mubr.msk.bf16.vlgmr.msra.gmra.mrb[28].mxu1 %vm468_vm0, %v1437_v35 }
 0xa40   : > { %2239 = vmatpush3.bf16.msra.mxu1 %v2839_v26  ;;  %2242 = vmatprep.mubr.msk.bf16.mxu1 %vm2625_vm1, %v2624_v7 }
 0xa41   : > { %2240 = vmatprep.subr.bf16.mxu1 %v2624_v7 }
 0xa44   : > { %2241 = vmatpush3.bf16.msra.mxu1 %v2847_v34 }
 0xa45   : > { %2252 = vmatprep.subr.bf16.mxu1 %v2624_v7 }
 0xb12   : > { %v1475_v8 = vpop.f32.mrb[28].mxu1 }
 0xb13   : > { %v1476_v16 = vadd.f32 %v2872_v61, %v1475_v8  ;;  %v2230_v36 = vpop.f32.mrb[29].mxu1 }
 0xb14   : > { %v1478_v37 = vpop.f32.mrb[30].mxu1  ;;  %v2488_v36 = vld [vmem:[%s3244_s6] sm:$0xff]  }
 0xb15   : > { %v1481_v63 = vmax.f32 %v1476_v16, 0.0  ;;  %v2231_v38 = vpop.f32.mrb[31].mxu1 }
 0xb17   : > { %v1482_v39 = vpack.c.bf16 %v1481_v63, %v1481_v63 }
 0xb19   : > { %2235 = vmatmul.mubr.msk.bf16.vlgmr.msra.gmra.mrb[28].mxu0 %vm570_vm2, %v1482_v39 }
 0xb1a   : > { %2247 = vmatpush3.bf16.msra.mxu0 %v2865_v45  ;;  %2248 = vmatprep.mubr.msk.bf16.mxu0 %vm2625_vm1, %v2624_v7 }
 0xb1b   : > { %2260 = vmatprep.subr.bf16.mxu0 %v2624_v7 }
 0xbec   : > { %v1520_v26 = vpop.f32.mrb[28].mxu0 }
 0xbed   : > { %v1521_v34 = vadd.f32 %v2886_v6, %v1520_v26  ;;  %v2236_v40 = vpop.f32.mrb[29].mxu0 }
 0xbee   : > { %v1523_v41 = vpop.f32.mrb[30].mxu0 }
 0xbef   : > { %v2237_v42 = vpop.f32.mrb[31].mxu0  ;;  %v1527_v43 = vrot.slane %v1521_v34, 3  ;;  %v1528_v44 = vrot.slane %v1521_v34, 4  ;;  %v1529_v46 = vrot.slane %v1521_v34, 5  ;;  %v1530_v47 = vrot.slane %v1521_v34, 6 }
 0xbf0   : > { %v1531_v48 = vrot.slane %v1521_v34, 7  ;;  %v1532_v49 = vrot.slane %v1521_v34, 1  ;;  %v1533_v50 = vrot.slane %v1521_v34, 2  ;;  %v1547_v58 = vadd.f32 %v1521_v34, %v2900_v22 }
 0xbf1   : > { %v1542_v51 = vadd.f32 %v1527_v43, %v2888_v9  ;;  %v1543_v52 = vadd.f32 %v1528_v44, %v2895_v14  ;;  %v1544_v53 = vadd.f32 %v1529_v46, %v2891_v12  ;;  %v1545_v54 = vadd.f32 %v1530_v47, %v2893_v13 }
 0xbf2   : > { %v1546_v55 = vadd.f32 %v1531_v48, %v2897_v15  ;;  %v1548_v56 = vadd.f32 %v1532_v49, %v2905_v31  ;;  %v1549_v57 = vadd.f32 %v1533_v50, %v2908_v33 }
 0xbf3   : > { %2440 = vtanh.f32 %v1542_v51 }
 0xbf4   : > { %2442 = vtanh.f32 %v1543_v52 }
 0xbf5   : > { %2444 = vtanh.f32 %v1544_v53 }
 0xbf6   : > { %2446 = vtanh.f32 %v1545_v54 }
 0xbf7   : > { %2448 = vtanh.f32 %v1546_v55 }
 0xbf8   : > { %2450 = vtanh.f32 %v1548_v56 }
 0xbf9   : > { %2452 = vtanh.f32 %v1549_v57 }
 0xbfa   : > { %2454 = vtanh.f32 %v1547_v58 }
 0xbfd   : > { %v2441_v59 = vpop.eup %2440 }
 0xbfe   : > { %v2443_v60 = vpop.eup %2442  ;;  %v1570_v62 = vrot.slane %v2441_v59, 5 }
 0xbff   : > { %v2445_v0 = vpop.eup %2444  ;;  %v1571_v1 = vrot.slane %v2443_v60, 4 }
 0xc00   : > { %v2447_v3 = vpop.eup %2446  ;;  %v1573_v4 = vrot.slane %v2445_v0, 3 }
 0xc01   : > { %v2449_v5 = vpop.eup %2448  ;;  %v1572_v10 = vsel %vm819_vm4, %v1571_v1, %v1570_v62  ;;  %v1575_v2 = vrot.slane %v2447_v3, 2 }
 0xc02   : > { %v2451_v11 = vpop.eup %2450  ;;  %v1574_v17 = vsel %vm822_vm5, %v1573_v4, %v1572_v10  ;;  %v1577_v20 = vrot.slane %v2449_v5, 1 }
 0xc03   : > { %v2453_v21 = vpop.eup %2452  ;;  %v1576_v23 = vsel %vm825_vm6, %v1575_v2, %v1574_v17  ;;  %v1580_v27 = vrot.slane %v2451_v11, 7 }
 0xc04   : > { %v2455_v24 = vpop.eup %2454  ;;  %v1578_v25 = vsel %vm828_vm7, %v1577_v20, %v1576_v23  ;;  %v1582_v29 = vrot.slane %v2453_v21, 6 }
 0xc05   : > { %v1579_v28 = vsel %vm831_vm8, %v2455_v24, %v1578_v25  ;;  %v1709_v24 = vpop.permute.xlu0 %1708 }
 0xc06   : > { %v1581_v30 = vsel %vm834_vm9, %v1580_v27, %v1579_v28 }
 0xc07   : > { %v1583_v35 = vsel %vm837_vm10, %v1582_v29, %v1581_v30 }
 0xc08   : > { %v3114_v8 = vsel %vm1561_vm12, %v1583_v35, %v3079_v32 }
 0xc09   : > { %1897 = vrot.lane.b32.xlu0 %v3114_v8, %s2634_s30  ;;  %v1586_v16 = vpack.c.bf16 %v3114_v8, %v3114_v8 }
 0xc0b   : > { %2243 = vmatmul.mubr.msk.bf16.vlgmr.msra.gmra.mrb[32].mxu1 %vm468_vm0, %v1586_v16 }
 0xc0c   : > { %2253 = vmatpush3.bf16.msra.mxu1 %v2488_v36  ;;  %2256 = vmatprep.mubr.msk.bf16.mxu1 %vm2625_vm1, %v2624_v7 }
 0xc0d   : > { %2254 = vmatprep.subr.bf16.mxu1 %v2624_v7 }
 0xc10   : > { %2255 = vmatpush3.bf16.msra.mxu1 %v2489_v18 }
 0xcde   : > { %v1624_v37 = vpop.f32.mrb[32].mxu1 }
 0xcdf   : > { %v1625_v63 = vadd.f32 %v2872_v61, %v1624_v37  ;;  %v2244_v38 = vpop.f32.mrb[33].mxu1  ;;  %v2490_v37 = vld [vmem:[%s3245_s7] ss:$0 sm:$0xff] }
 0xce0   : > { %v1627_v39 = vpop.f32.mrb[34].mxu1 }
 0xce1   : > { %v1630_v26 = vmax.f32 %v1625_v63, 0.0  ;;  %v2245_v34 = vpop.f32.mrb[35].mxu1 }
 0xce3   : > { %v1631_v40 = vpack.c.bf16 %v1630_v26, %v1630_v26 }
 0xce5   : > { %2249 = vmatmul.mubr.msk.bf16.vlgmr.msra.gmra.mrb[32].mxu0 %vm570_vm2, %v1631_v40 }
 0xce6   : > { %2261 = vmatpush3.bf16.msra.mxu0 %v2865_v45  ;;  %2262 = vmatprep.mubr.msk.bf16.mxu0 %vm2625_vm1, %v2624_v7  ;;  %vm1710_vm1 = vcmp.eq.s32.totalorder %v1709_v24, 1 }
 0xdb8   : > { %v1669_v41 = vpop.f32.mrb[32].mxu0 }
 0xdb9   : > { %v1670_v42 = vadd.f32 %v2886_v6, %v1669_v41  ;;  %v2250_v43 = vpop.f32.mrb[33].mxu0  ;;  %v2491_v41 = vld [vmem:[%s3247_s9] ss:$0 sm:$0xff] }
 0xdba   : > { %v1672_v44 = vpop.f32.mrb[34].mxu0 }
 0xdbb   : > { %v2251_v46 = vpop.f32.mrb[35].mxu0  ;;  %v1676_v47 = vrot.slane %v1670_v42, 2  ;;  %v1677_v61 = vrot.slane %v1670_v42, 3  ;;  %v1678_v48 = vrot.slane %v1670_v42, 4  ;;  %v1679_v49 = vrot.slane %v1670_v42, 5 }
 0xdbc   : > { %v1680_v50 = vrot.slane %v1670_v42, 6  ;;  %v1681_v51 = vrot.slane %v1670_v42, 7  ;;  %v1682_v52 = vrot.slane %v1670_v42, 1  ;;  %v1697_v57 = vadd.f32 %v1670_v42, %v2905_v31 }
 0xdbd   : > { %v1691_v53 = vadd.f32 %v1676_v47, %v2888_v9  ;;  %v1692_v45 = vadd.f32 %v1677_v61, %v2895_v14  ;;  %v1693_v54 = vadd.f32 %v1678_v48, %v2891_v12  ;;  %v1694_v7 = vadd.f32 %v1679_v49, %v2893_v13 }
 0xdbe   : > { %v1695_v6 = vadd.f32 %v1680_v50, %v2897_v15  ;;  %v1696_v55 = vadd.f32 %v1681_v51, %v2900_v22  ;;  %v1698_v56 = vadd.f32 %v1682_v52, %v2908_v33 }
 0xdbf   : > { %2456 = vtanh.f32 %v1691_v53 }
 0xdc0   : > { %2458 = vtanh.f32 %v1692_v45 }
 0xdc1   : > { %2460 = vtanh.f32 %v1693_v54 }
 0xdc2   : > { %2462 = vtanh.f32 %v1694_v7 }
 0xdc3   : > { %2464 = vtanh.f32 %v1695_v6 }
 0xdc4   : > { %2466 = vtanh.f32 %v1696_v55 }
 0xdc5   : > { %2468 = vtanh.f32 %v1698_v56 }
 0xdc6   : > { %2470 = vtanh.f32 %v1697_v57 }
 0xdc9   : > { %v2457_v58 = vpop.eup %2456 }
 0xdca   : > { %v2459_v59 = vpop.eup %2458  ;;  %v1719_v60 = vrot.slane %v2457_v58, 6 }
 0xdcb   : > { %v2461_v62 = vpop.eup %2460  ;;  %v1720_v0 = vrot.slane %v2459_v59, 5 }
 0xdcc   : > { %v2463_v1 = vpop.eup %2462  ;;  %v1722_v3 = vrot.slane %v2461_v62, 4 }
 0xdcd   : > { %v2465_v4 = vpop.eup %2464  ;;  %v1721_v5 = vsel %vm819_vm4, %v1720_v0, %v1719_v60  ;;  %v1724_v10 = vrot.slane %v2463_v1, 3 }
 0xdce   : > { %v2467_v2 = vpop.eup %2466  ;;  %v1723_v11 = vsel %vm822_vm5, %v1722_v3, %v1721_v5  ;;  %v1726_v17 = vrot.slane %v2465_v4, 2 }
 0xdcf   : > { %v2469_v20 = vpop.eup %2468  ;;  %v1725_v21 = vsel %vm825_vm6, %v1724_v10, %v1723_v11  ;;  %v1728_v23 = vrot.slane %v2467_v2, 1 }
 0xdd0   : > { %v1727_v25 = vsel %vm828_vm7, %v1726_v17, %v1725_v21  ;;  %v2471_v27 = vpop.eup %2470  ;;  %v1731_v29 = vrot.slane %v2469_v20, 7 }
 0xdd1   : > { %v1729_v28 = vsel %vm831_vm8, %v1728_v23, %v1727_v25  ;;  %v1898_v23 = vpop.permute.xlu0 %1897 }
 0xdd2   : > { %v1730_v30 = vsel %vm834_vm9, %v2471_v27, %v1729_v28  ;;  %v1913_v25 = vsel %vm468_vm0, %v3079_v32, %v1898_v23 }
 0xdd3   : > { %v1732_v35 = vsel %vm837_vm10, %v1731_v29, %v1730_v30 }
 0xdd4   : > { %v3152_v16 = vsel %vm1710_vm1, %v1732_v35, %v3114_v8 }
 0xdd5   : > { %1901 = vrot.lane.b32.xlu0 %v3152_v16, %s2635_s29  ;;  %v1735_v36 = vpack.c.bf16 %v3152_v16, %v3152_v16  ;;  %s1933_s29 = sshll.u32 %s3052_s28, 4  ;;  %s3194_s29 = int_to_ptr.vmem [resolvable:$true] %s1933_s29 }
 0xdd6   : > { %p2555_p7 = scmp.lt.s32.totalorder %s3194_s29, %s2553_s12 }
 0xdd7   : > { %2257 = vmatmul.mubr.msk.bf16.vlgmr.msra.gmra.mrb[36].mxu1 %vm468_vm0, %v1735_v36 }
 0xe47   : > { %v1902_v24 = vpop.permute.xlu0 %1901 }
 0xe48   : > { %v1914_v27 = vsel %vm1909_vm15, %v1913_v25, %v1902_v24 }
 0xeaa   : > { %v1773_v18 = vpop.f32.mrb[36].mxu1 }
 0xeab   : > { %v1774_v63 = vadd.f32 %v2490_v37, %v1773_v18  ;;  %v2258_v38 = vpop.f32.mrb[37].mxu1 }
 0xeac   : > { %v1776_v39 = vpop.f32.mrb[38].mxu1 }
 0xead   : > { %v1779_v26 = vmax.f32 %v1774_v63, 0.0  ;;  %v2259_v34 = vpop.f32.mrb[39].mxu1 }
 0xeaf   : > { %v1780_v8 = vpack.c.bf16 %v1779_v26, %v1779_v26 }
 0xeb1   : > { %2263 = vmatmul.mubr.msk.bf16.vlgmr.msra.gmra.mrb[36].mxu0 %vm570_vm2, %v1780_v8  ;;  %vm1859_vm2 = vcmp.eq.s32.totalorder %v3043_v19, 1 }
 0xf84   : > { %v1818_v40 = vpop.f32.mrb[36].mxu0 }
 0xf85   : > { %v1819_v42 = vadd.f32 %v2491_v41, %v1818_v40  ;;  %v2264_v43 = vpop.f32.mrb[37].mxu0 }
 0xf86   : > { %v1821_v44 = vpop.f32.mrb[38].mxu0 }
 0xf87   : > { %v2265_v46 = vpop.f32.mrb[39].mxu0  ;;  %v1825_v47 = vrot.slane %v1819_v42, 1  ;;  %v1826_v61 = vrot.slane %v1819_v42, 2  ;;  %v1827_v48 = vrot.slane %v1819_v42, 3  ;;  %v1828_v49 = vrot.slane %v1819_v42, 4 }
 0xf88   : > { %v1829_v50 = vrot.slane %v1819_v42, 5  ;;  %v1830_v51 = vrot.slane %v1819_v42, 6  ;;  %v1831_v52 = vrot.slane %v1819_v42, 7  ;;  %v1847_v57 = vadd.f32 %v1819_v42, %v2908_v33 }
 0xf89   : > { %v1840_v53 = vadd.f32 %v1825_v47, %v2888_v9  ;;  %v1841_v45 = vadd.f32 %v1826_v61, %v2895_v14  ;;  %v1842_v54 = vadd.f32 %v1827_v48, %v2891_v12  ;;  %v1843_v7 = vadd.f32 %v1828_v49, %v2893_v13 }
 0xf8a   : > { %v1844_v6 = vadd.f32 %v1829_v50, %v2897_v15  ;;  %v1845_v55 = vadd.f32 %v1830_v51, %v2900_v22  ;;  %v1846_v56 = vadd.f32 %v1831_v52, %v2905_v31 }
 0xf8b   : > { %2472 = vtanh.f32 %v1840_v53 }
 0xf8c   : > { %2474 = vtanh.f32 %v1841_v45 }
 0xf8d   : > { %2476 = vtanh.f32 %v1842_v54 }
 0xf8e   : > { %2478 = vtanh.f32 %v1843_v7 }
 0xf8f   : > { %2480 = vtanh.f32 %v1844_v6 }
 0xf90   : > { %2482 = vtanh.f32 %v1845_v55 }
 0xf91   : > { %2484 = vtanh.f32 %v1846_v56 }
 0xf92   : > { %2486 = vtanh.f32 %v1847_v57 }
 0xf95   : > { %v2473_v9 = vpop.eup %2472 }
 0xf96   : > { %v2475_v12 = vpop.eup %2474  ;;  %v1868_v14 = vrot.slane %v2473_v9, 7 }
 0xf97   : > { %v2477_v13 = vpop.eup %2476  ;;  %v1869_v58 = vrot.slane %v2475_v12, 6 }
 0xf98   : > { %v2479_v15 = vpop.eup %2478  ;;  %v1871_v59 = vrot.slane %v2477_v13, 5 }
 0xf99   : > { %v2481_v60 = vpop.eup %2480  ;;  %v1870_v22 = vsel %vm819_vm4, %v1869_v58, %v1868_v14  ;;  %v1873_v62 = vrot.slane %v2479_v15, 4 }
 0xf9a   : > { %v2483_v31 = vpop.eup %2482  ;;  %v1872_v0 = vsel %vm822_vm5, %v1871_v59, %v1870_v22  ;;  %v1875_v1 = vrot.slane %v2481_v60, 3 }
 0xf9b   : > { %v2485_v33 = vpop.eup %2484  ;;  %v1874_v3 = vsel %vm825_vm6, %v1873_v62, %v1872_v0  ;;  %v1877_v4 = vrot.slane %v2483_v31, 2 }
 0xf9c   : > { %v1876_v5 = vsel %vm828_vm7, %v1875_v1, %v1874_v3  ;;  %v1879_v10 = vrot.slane %v2485_v33, 1  ;;  %v2487_v11 = vpop.eup %2486 }
 0xf9d   : > { %v1878_v2 = vsel %vm831_vm8, %v1877_v4, %v1876_v5 }
 0xf9e   : > { %v1880_v17 = vsel %vm834_vm9, %v1879_v10, %v1878_v2 }
 0xf9f   : > { %v1881_v20 = vsel %vm837_vm10, %v2487_v11, %v1880_v17 }
 0xfa0   : > { %v1883_v21 = vsel %vm1859_vm2, %v1881_v20, %v3152_v16 }
 0xfa1   : > { %1905 = vrot.lane.b32.xlu0 %v1883_v21, %s2636_s21  ;;  %s2548_s21 = scalar_lea.vmem %s3194_s29, 256 }
 0xfa2   : > { %p2549_p1 = scmp.ne.s32.totalorder %s3194_s29, %s2548_s21  ;;  %p2556_p8 = scmp.lt.s32.totalorder %s2554_s20, %s2548_s21 }
 0xfa4   : > { %p2550_p3 = pnand %p2549_p1, %p3264_p2  ;;  %p2557_p11 = por %p2556_p8, %p2555_p7 }
 0xfa6   : > { %p2551_p4 = pneg %p2550_p3 }
 0xfa8   : > { %p2558_p13 = pnand %p2557_p11, %p2551_p4 }
0x1013   : > { %v1906_v28 = vpop.permute.xlu0 %1905 }
0x1014   : > { %v1915_v19 = vsel %vm1911_vm3, %v1914_v27, %v1906_v28 }
0x1015   : > { %1917 = vst [vmem:[%s3052_s28 + $0x8] sm:$0xff] %v1915_v19 }
0x1016   : > { %2561 = shalt.err (!%p2558_p13)
}
0x1017   : > { %s2562_s25 = scalar_lea.hbm %s3192_s27, 256  ;;  %s2566_s30 = scalar_lea.hbm %s3248_s10, 512 }
0x1018   : > { %p2563_p0 = scmp.ne.s32.totalorder %s3192_s27, %s2562_s25  ;;  %p2567_p9 = scmp.lt.u32.totalorder %s3192_s27, %s3248_s10 }
0x1019   : > { %p2568_p10 = scmp.lt.u32.totalorder %s2566_s30, %s2562_s25  ;;  %p2570_p1 = scmp.lt.u32.totalorder %s2562_s25, %s3192_s27 }
0x101a   : > { %p2564_p6 = pnand %p2563_p0, %p3264_p2 }
0x101b   : > { %p2569_p12 = por %p2568_p10, %p2567_p9 }
0x101c   : > { %p2565_p5 = pneg %p2564_p6 }
0x101d   : > { %p2571_p3 = por %p2570_p1, %p2569_p12 }
0x101f   : > { %p2572_p4 = pnand %p2571_p3, %p2565_p5 }
0x1021   : > { %2575 = shalt.err (!%p2572_p4)
}
0x1022   : > { %2274 = dma.vmem_to_hbm [thread:$0]  (%p3264_p2), %s3194_s29, 256, %s3192_s27, %s1919_s17  }
0x1023 PF: > { %p2291_p7 = scmp.ge.s32.totalorder %s2618_s16, 2  ;;  %s1945_s11 = sand.u32 1, %s2606_s13  }
0x1024   : > { %p3265_p8 = scmp.ne.s32.totalorder %s3256_s24, 0  ;;  %s1946_s21 = scalar_lea.sflag [#allocation4], %s1945_s11 }
0x1026   : > { %p2284_p11 = pnand %p2291_p7, %p3265_p8 }
0x1028   : > { %2601 = dma.done.wait (!%p2284_p11), %s1946_s21, 256  }
0x1029   : > { %2603 = vsyncadd (!%p2284_p11), %s1946_s21, 4294967040  ;;  %s3266_s15 = sld [smem:[#allocation11_spill]]  ;;  %s3267_s12 = sld [smem:[#allocation12_spill]] }
0x102a   : > { %p22_p13 = scmp.ge.s32.totalorder %s2718_s19, 4   ;;  %s3268_s13 = smov %s2610_s14 }
0x102b   : > { %s3271_s16 = smov %s2718_s19 }
0x102c   :  { %24 = sbr.rel (!%p22_p13) target bundleno = 5 (0x5), region = 107 }
0x102f   : > { %s3269_s14 = smov %s3266_s15  ;;  %s3270_s15 = smov %s3267_s12 }
0x1033   :  { %1951 = vsyncpa [#allocation3], 1 }
0x1034   :  { %1953 = vsyncpa [#allocation3 + $0x1], 1 }
0x1035   :  { %1954 = vsyncpa [#allocation6], 1 }
0x1036   :  { %1955 = vsyncpa [#allocation4], 1 }
0x1037   :  { %1957 = vsyncpa [#allocation4 + $0x1], 1 }

</bundles_post_ra>
